<compile_context>
chip_gen: v7x
topology: tpu7x:2x2x1
jax: 0.10.0
libtpu: 0.0.40
codegen_flags: <defaults>
</compile_context>

<pallas_src>
import functools

import jax
import jax.numpy as jnp
from jax.experimental import pallas as pl
from jax.experimental.pallas import tpu as pltpu


# ----------------------------------------------------------------------------
# Shared: build the (Nb*H*W, 9*Cin) im2col patch from a padded NHWC block.
# ----------------------------------------------------------------------------
def _build_patch(x_ref):
    Nb, Hp2, Wp2, Cin = x_ref.shape
    H, W = Hp2 - 2, Wp2 - 2
    xb = x_ref[...]                                               # bf16
    # kx shifts concatenated on the channel (lane) axis -> K = 3*Cin.
    xw = jnp.concatenate(
        [xb[:, :, 0:W, :], xb[:, :, 1:W + 1, :], xb[:, :, 2:W + 2, :]], axis=-1)
    # ky shifts folded in as well -> single K = 9*Cin contraction, one MXU matmul,
    # only one materialized patch (no 3 live per-ky copies).
    patch = jnp.concatenate(
        [xw[:, 0:H, :, :], xw[:, 1:H + 1, :, :], xw[:, 2:H + 2, :, :]], axis=-1)
    return patch.reshape(Nb * H * W, 9 * Cin)


# ----------------------------------------------------------------------------
# Pass 1: conv (bf16 MXU, f32 acc) + per-chunk centered batch statistics.
# ----------------------------------------------------------------------------
def _conv_stats_kernel(x_ref, w_ref, s_ref, m2_ref):
    # x_ref : (Nb, H+2, W+2, Cin) bf16 padded NHWC input block
    # w_ref : (9*Cin, Cout)       bf16 weights, index = ky*3*Cin + kx*Cin + cin
    # s_ref : (1, 1, Cout) f32    per-chunk sum
    # m2_ref: (1, 1, Cout) f32    per-chunk centered sum of squares
    Nb, Hp2, Wp2, Cin = x_ref.shape
    H, W = Hp2 - 2, Wp2 - 2
    Cout = w_ref.shape[1]
    cnt = float(Nb * H * W)

    patch = _build_patch(x_ref)
    acc = jnp.dot(patch, w_ref[...], preferred_element_type=jnp.float32)

    s = jnp.sum(acc, axis=0, keepdims=True)                       # (1, Cout)
    mean_c = s * (1.0 / cnt)
    d = acc - mean_c
    m2 = jnp.sum(d * d, axis=0, keepdims=True)                    # centered (stable)
    s_ref[...] = s.reshape(1, 1, Cout)
    m2_ref[...] = m2.reshape(1, 1, Cout)


# ----------------------------------------------------------------------------
# Pass 2: recompute conv + folded BatchNorm scale/shift + LeakyReLU, write once.
# ----------------------------------------------------------------------------
def _conv_bn_lrelu_kernel(x_ref, w_ref, scale_ref, shift_ref, o_ref, *,
                          negative_slope):
    # o_ref : (Nb, Cout, HWp) f32, channels-first flat-spatial, lane-dense last dim.
    Nb, Hp2, Wp2, Cin = x_ref.shape
    H, W = Hp2 - 2, Wp2 - 2
    HW = H * W
    Cout = w_ref.shape[1]
    HWp = o_ref.shape[2]

    patch = _build_patch(x_ref)
    acc = jnp.dot(patch, w_ref[...], preferred_element_type=jnp.float32)

    z = acc * scale_ref[...] + shift_ref[...]                     # (Nb*HW, Cout)
    z = jnp.where(z >= 0, z, negative_slope * z)
    zt = jnp.transpose(z.reshape(Nb, HW, Cout), (0, 2, 1))        # one batched XLU op
    if HWp != HW:
        zt = jnp.pad(zt, ((0, 0), (0, 0), (0, HWp - HW)))
    o_ref[...] = zt


def conv_dropout_norm_nonlin(x_nchw, weight, bias, gamma, beta,
                             eps=1e-5, negative_slope=0.01):
    """Forward pass of ConvDropoutNormNonlin. Returns (out_nchw, kl)."""
    N, Cin, H, W = x_nchw.shape
    Cout = weight.shape[0]                     # PyTorch weight layout (Cout, Cin, 3, 3)
    Hp2, Wp2 = H + 2, W + 2
    HW = H * W
    HWp = ((HW + 127) // 128) * 128            # lane-dense output last dim
    K9 = 9 * Cin

    # --- layout glue: NCHW -> padded NHWC in bf16 (halves this HBM round trip). ---
    # TODO(synk): the lanes=HW formulation ((Cout,9Cin)@(9Cin,HW_tile) directly on the
    # NCHW input) would eliminate this extra pass over the input entirely.
    x = jnp.transpose(x_nchw, (0, 2, 3, 1)).astype(jnp.bfloat16)
    x_pad = jnp.pad(x, ((0, 0), (1, 1), (1, 1), (0, 0)))

    # Weights: (Cout, Cin, 3, 3) -> (ky, kx, cin, cout) -> (9*Cin, Cout), bf16.
    # Flat index = ky*3*Cin + kx*Cin + cin, matching the in-kernel concat ordering.
    w = jnp.transpose(weight, (2, 3, 1, 0)).reshape(K9, Cout).astype(jnp.bfloat16)

    # Conv bias is exactly cancelled by BatchNorm's mean subtraction -> drop it.
    del bias

    # --- per-generation VMEM budget + honest peak accounting for block selection ---
    try:
        vmem_cap = int(pltpu.get_tpu_info().vmem_capacity_bytes)
    except Exception:
        vmem_cap = 64 * 1024 * 1024            # conservative: v7x per-TensorCore VMEM

    def peak_bytes(nb):
        in_blk = nb * Hp2 * Wp2 * Cin * 2      # bf16 input DMA window
        w_blk = K9 * Cout * 2
        xw_tmp = nb * Hp2 * W * 3 * Cin * 2    # kx-concat temporary (bf16)
        patch = nb * HW * K9 * 2               # im2col patch (bf16), one copy live
        acc = nb * HW * Cout * 4               # f32 matmul result
        zt = nb * Cout * HWp * 4               # transposed activation temporary
        out_blk = nb * Cout * HWp * 4          # output DMA window
        # DMA windows double-buffered (x2); temporaries counted once.
        return 2 * in_blk + 2 * w_blk + xw_tmp + patch + acc + zt + 2 * out_blk

    budget = vmem_cap * 3 // 8                 # ~24 MiB on v7x, ~48 MiB on v5e/v6e
    Nb = 1
    for d in range(1, N + 1):
        if N % d:
            continue
        if N >= 2 and N // d < 2:
            continue                           # keep >= 2 grid steps for megacore
        if peak_bytes(d) <= budget:
            Nb = d
    G = N // Nb
    # TODO(synk): if peak_bytes(1) > budget (large H*W, e.g. 512x512), an H-row grid
    # axis with a +2 halo (element-indexed blocks or manual DMA) is required rather
    # than just raising the VMEM limit.
    vmem_limit = int(min(vmem_cap * 3 // 4,
                         max(16 * 1024 * 1024, peak_bytes(Nb) + 4 * 1024 * 1024)))
    cparams = pltpu.CompilerParams(dimension_semantics=("parallel",),
                                   vmem_limit_bytes=vmem_limit)

    # --- pass 1: conv + per-chunk centered batch statistics (no y writeback) ---
    s, m2 = pl.pallas_call(
        _conv_stats_kernel,
        out_shape=(
            jax.ShapeDtypeStruct((G, 1, Cout), jnp.float32),
            jax.ShapeDtypeStruct((G, 1, Cout), jnp.float32),
        ),
        grid_spec=pltpu.PrefetchScalarGridSpec(
            num_scalar_prefetch=0,
            grid=(G,),
            in_specs=[
                pl.BlockSpec((Nb, Hp2, Wp2, Cin), lambda g: (g, 0, 0, 0)),
                pl.BlockSpec((K9, Cout), lambda g: (0, 0)),
            ],
            out_specs=(
                pl.BlockSpec((1, 1, Cout), lambda g: (g, 0, 0)),
                pl.BlockSpec((1, 1, Cout), lambda g: (g, 0, 0)),
            ),
        ),
        compiler_params=cparams,
    )(x_pad, w)

    # --- tiny glue: parallel-variance combine + fold BN into scale/shift ---
    n_c = jnp.float32(Nb * HW)
    total = jnp.float32(N * HW)
    s_g = s[:, 0, :]                           # (G, Cout)
    m2_g = m2[:, 0, :]                         # (G, Cout)
    mean_g = s_g / n_c
    mean = jnp.sum(s_g, axis=0) / total
    var = (jnp.sum(m2_g, axis=0)
           + n_c * jnp.sum((mean_g - mean) ** 2, axis=0)) / total
    var = jnp.maximum(var, 0.0)                # biased variance (BN training forward)
    scale = gamma.astype(jnp.float32) / jnp.sqrt(var + eps)
    shift = beta.astype(jnp.float32) - mean * scale

    # TODO(synk): Dropout2d(p=0.5) is identity here (eval-mode semantics).

    # --- pass 2: recompute conv, fused scale/shift + LeakyReLU, single writeback ---
    out_flat = pl.pallas_call(
        functools.partial(_conv_bn_lrelu_kernel, negative_slope=negative_slope),
        out_shape=jax.ShapeDtypeStruct((N, Cout, HWp), jnp.float32),
        grid_spec=pltpu.PrefetchScalarGridSpec(
            num_scalar_prefetch=0,
            grid=(G,),
            in_specs=[
                pl.BlockSpec((Nb, Hp2, Wp2, Cin), lambda g: (g, 0, 0, 0)),
                pl.BlockSpec((K9, Cout), lambda g: (0, 0)),
                pl.BlockSpec((1, Cout), lambda g: (0, 0)),
                pl.BlockSpec((1, Cout), lambda g: (0, 0)),
            ],
            out_specs=pl.BlockSpec((Nb, Cout, HWp), lambda g: (g, 0, 0)),
        ),
        compiler_params=cparams,
    )(x_pad, w, scale.reshape(1, Cout), shift.reshape(1, Cout))

    if HWp != HW:
        out_flat = out_flat[:, :, :HW]
    out_nchw = out_flat.reshape(N, Cout, H, W)  # free metadata reshape (NCHW)
    kl = jnp.float32(0.0)
    return out_nchw, kl


# ----------------------------------------------------------------------------
# Pure-JAX reference (f32 conv) for correctness check only.
# ----------------------------------------------------------------------------
def _reference(x_nchw, weight, bias, gamma, beta, eps=1e-5, negative_slope=0.01):
    y = jax.lax.conv_general_dilated(
        x_nchw.astype(jnp.float32), weight.astype(jnp.float32),
        window_strides=(1, 1), padding=((1, 1), (1, 1)),
        dimension_numbers=("NCHW", "OIHW", "NCHW"))
    y = y + bias.reshape(1, -1, 1, 1)
    mean = jnp.mean(y, axis=(0, 2, 3), keepdims=True)
    var = jnp.mean((y - mean) ** 2, axis=(0, 2, 3), keepdims=True)
    z = (y - mean) / jnp.sqrt(var + eps)
    z = z * gamma.reshape(1, -1, 1, 1) + beta.reshape(1, -1, 1, 1)
    return jnp.where(z >= 0, z, negative_slope * z)


if __name__ == "__main__":
    key = jax.random.PRNGKey(0)
    k_x, k_w, k_b, k_g, k_be = jax.random.split(key, 5)

    N, Cin, Cout, H, W = 2, 4, 8, 16, 16

    x = jax.random.normal(k_x, (N, Cin, H, W), dtype=jnp.float32)
    weight = jax.random.normal(k_w, (Cout, Cin, 3, 3), dtype=jnp.float32) * 0.1
    bias = jax.random.normal(k_b, (Cout,), dtype=jnp.float32) * 0.1
    gamma = 1.0 + 0.1 * jax.random.normal(k_g, (Cout,), dtype=jnp.float32)
    beta = 0.1 * jax.random.normal(k_be, (Cout,), dtype=jnp.float32)

    fwd = jax.jit(conv_dropout_norm_nonlin)
    out, kl = fwd(x, weight, bias, gamma, beta)
    out = jax.block_until_ready(out)
    kl = jax.block_until_ready(kl)

    ref = _reference(x, weight, bias, gamma, beta)
    assert out.shape == (N, Cout, H, W)
    # bf16 MXU operands (f32 accumulation) vs f32 reference: bf16-level tolerance.
    assert jnp.allclose(out, ref, atol=4e-2, rtol=4e-2), "mismatch vs reference"
    assert float(kl) == 0.0

    print("KERNEL_OK")
</pallas_src>

<mosaic_0001>
module attributes {stable_mosaic.version = 11 : i64} {
  func.func @_conv_stats_kernel(%arg0: i32, %arg1: memref<1x18x18x4xbf16, #tpu.memory_space<vmem>>, %arg2: memref<36x8xbf16, #tpu.memory_space<vmem>>, %arg3: memref<1x1x8xf32, #tpu.memory_space<vmem>>, %arg4: memref<1x1x8xf32, #tpu.memory_space<vmem>>) attributes {dimension_semantics = [#tpu.dimension_semantics<parallel>], iteration_bounds = array<i64: 2>, scalar_prefetch = 0 : i64, scratch_operands = 0 : i64, tpu.core_type = #tpu.core_type<tc>, window_params = [{transform_indices = @transform_0, window_bounds = array<i64: 1, 18, 18, 4>}, {pipeline_mode = #tpu.pipeline_mode<synchronous>, transform_indices = @transform_1, window_bounds = array<i64: 36, 8>}, {transform_indices = @transform_2, window_bounds = array<i64: 1, 1, 8>}, {transform_indices = @transform_3, window_bounds = array<i64: 1, 1, 8>}]} {
    %c0 = arith.constant 0 : index
    %c0_0 = arith.constant 0 : index
    %c0_1 = arith.constant 0 : index
    %c0_2 = arith.constant 0 : index
    %0 = vector.load %arg1[%c0, %c0_0, %c0_1, %c0_2] : memref<1x18x18x4xbf16, #tpu.memory_space<vmem>>, vector<1x18x18x4xbf16>
    %1 = vector.extract_strided_slice %0 {offsets = [0, 0, 0, 0], sizes = [1, 18, 16, 4], strides = [1, 1, 1, 1]} : vector<1x18x18x4xbf16> to vector<1x18x16x4xbf16>
    %2 = vector.extract_strided_slice %0 {offsets = [0, 0, 1, 0], sizes = [1, 18, 16, 4], strides = [1, 1, 1, 1]} : vector<1x18x18x4xbf16> to vector<1x18x16x4xbf16>
    %3 = vector.extract_strided_slice %0 {offsets = [0, 0, 2, 0], sizes = [1, 18, 16, 4], strides = [1, 1, 1, 1]} : vector<1x18x18x4xbf16> to vector<1x18x16x4xbf16>
    %4 = tpu.concatenate %1, %2, %3 in 3 : vector<1x18x16x4xbf16>, vector<1x18x16x4xbf16>, vector<1x18x16x4xbf16> -> vector<1x18x16x12xbf16>
    %5 = vector.extract_strided_slice %4 {offsets = [0, 0, 0, 0], sizes = [1, 16, 16, 12], strides = [1, 1, 1, 1]} : vector<1x18x16x12xbf16> to vector<1x16x16x12xbf16>
    %6 = vector.extract_strided_slice %4 {offsets = [0, 1, 0, 0], sizes = [1, 16, 16, 12], strides = [1, 1, 1, 1]} : vector<1x18x16x12xbf16> to vector<1x16x16x12xbf16>
    %7 = vector.extract_strided_slice %4 {offsets = [0, 2, 0, 0], sizes = [1, 16, 16, 12], strides = [1, 1, 1, 1]} : vector<1x18x16x12xbf16> to vector<1x16x16x12xbf16>
    %8 = tpu.concatenate %5, %6, %7 in 3 : vector<1x16x16x12xbf16>, vector<1x16x16x12xbf16>, vector<1x16x16x12xbf16> -> vector<1x16x16x36xbf16>
    %9 = vector.shape_cast %8 : vector<1x16x16x36xbf16> to vector<256x36xbf16>
    %c0_3 = arith.constant 0 : index
    %c0_4 = arith.constant 0 : index
    %10 = vector.load %arg2[%c0_3, %c0_4] : memref<36x8xbf16, #tpu.memory_space<vmem>>, vector<36x8xbf16>
    %cst = arith.constant dense<0.000000e+00> : vector<256x8xf32>
    %11 = tpu.matmul %9, %10, %cst {dimension_numbers = #tpu.dot_dimension_numbers<[1], [0], [0], [1], [0, 0, 1, 1], [], []>} : vector<256x36xbf16>, vector<36x8xbf16>, vector<256x8xf32> -> vector<256x8xf32>
    %cst_5 = arith.constant dense<0.000000e+00> : vector<8xf32>
    %12 = vector.multi_reduction <add>, %11, %cst_5 [0] : vector<256x8xf32> to vector<8xf32>
    %13 = vector.shape_cast %12 : vector<8xf32> to vector<1x8xf32>
    %cst_6 = arith.constant 3.906250e-03 : f32
    %14 = vector.broadcast %cst_6 : f32 to vector<1x8xf32>
    %15 = arith.mulf %13, %14 : vector<1x8xf32>
    %16 = vector.broadcast %15 : vector<1x8xf32> to vector<256x8xf32>
    %17 = arith.subf %11, %16 : vector<256x8xf32>
    %18 = arith.mulf %17, %17 : vector<256x8xf32>
    %cst_7 = arith.constant dense<0.000000e+00> : vector<8xf32>
    %19 = vector.multi_reduction <add>, %18, %cst_7 [0] : vector<256x8xf32> to vector<8xf32>
    %20 = vector.shape_cast %19 : vector<8xf32> to vector<1x8xf32>
    %21 = vector.shape_cast %13 : vector<1x8xf32> to vector<1x1x8xf32>
    %c0_8 = arith.constant 0 : index
    %c0_9 = arith.constant 0 : index
    %c0_10 = arith.constant 0 : index
    %22 = vector.load %arg3[%c0_8, %c0_9, %c0_10] : memref<1x1x8xf32, #tpu.memory_space<vmem>>, vector<1x1x8xf32>
    tpu.vector_store %arg3[%c0_8, %c0_9, %c0_10], %21 {strides = array<i32>} : memref<1x1x8xf32, #tpu.memory_space<vmem>>, vector<1x1x8xf32>,
    %23 = vector.shape_cast %20 : vector<1x8xf32> to vector<1x1x8xf32>
    %c0_11 = arith.constant 0 : index
    %c0_12 = arith.constant 0 : index
    %c0_13 = arith.constant 0 : index
    %24 = vector.load %arg4[%c0_11, %c0_12, %c0_13] : memref<1x1x8xf32, #tpu.memory_space<vmem>>, vector<1x1x8xf32>
    tpu.vector_store %arg4[%c0_11, %c0_12, %c0_13], %23 {strides = array<i32>} : memref<1x1x8xf32, #tpu.memory_space<vmem>>, vector<1x1x8xf32>,
    return
  }
  func.func @transform_0(%arg0: i32) -> (i32, i32, i32, i32) {
    %c0_i32 = arith.constant 0 : i32
    %c0_i32_0 = arith.constant 0 : i32
    %c0_i32_1 = arith.constant 0 : i32
    %c0_i32_2 = arith.constant 0 : i32
    return %arg0, %c0_i32, %c0_i32_0, %c0_i32_1 : i32, i32, i32, i32
  }
  func.func @transform_1(%arg0: i32) -> (i32, i32) {
    %c0_i32 = arith.constant 0 : i32
    %c0_i32_0 = arith.constant 0 : i32
    %c0_i32_1 = arith.constant 0 : i32
    return %c0_i32, %c0_i32_0 : i32, i32
  }
  func.func @transform_2(%arg0: i32) -> (i32, i32, i32) {
    %c0_i32 = arith.constant 0 : i32
    %c0_i32_0 = arith.constant 0 : i32
    %c0_i32_1 = arith.constant 0 : i32
    return %arg0, %c0_i32, %c0_i32_0 : i32, i32, i32
  }
  func.func @transform_3(%arg0: i32) -> (i32, i32, i32) {
    %c0_i32 = arith.constant 0 : i32
    %c0_i32_0 = arith.constant 0 : i32
    %c0_i32_1 = arith.constant 0 : i32
    return %arg0, %c0_i32, %c0_i32_0 : i32, i32, i32
  }
}

module attributes {stable_mosaic.version = 11 : i64} {
  func.func @_conv_bn_lrelu_kernel(%arg0: i32, %arg1: memref<1x18x18x4xbf16, #tpu.memory_space<vmem>>, %arg2: memref<36x8xbf16, #tpu.memory_space<vmem>>, %arg3: memref<1x8xf32, #tpu.memory_space<vmem>>, %arg4: memref<1x8xf32, #tpu.memory_space<vmem>>, %arg5: memref<1x8x256xf32, #tpu.memory_space<vmem>>) attributes {dimension_semantics = [#tpu.dimension_semantics<parallel>], iteration_bounds = array<i64: 2>, scalar_prefetch = 0 : i64, scratch_operands = 0 : i64, tpu.core_type = #tpu.core_type<tc>, window_params = [{transform_indices = @transform_0, window_bounds = array<i64: 1, 18, 18, 4>}, {pipeline_mode = #tpu.pipeline_mode<synchronous>, transform_indices = @transform_1, window_bounds = array<i64: 36, 8>}, {pipeline_mode = #tpu.pipeline_mode<synchronous>, transform_indices = @transform_2, window_bounds = array<i64: 1, 8>}, {pipeline_mode = #tpu.pipeline_mode<synchronous>, transform_indices = @transform_3, window_bounds = array<i64: 1, 8>}, {transform_indices = @transform_4, window_bounds = array<i64: 1, 8, 256>}]} {
    %c0 = arith.constant 0 : index
    %c0_0 = arith.constant 0 : index
    %c0_1 = arith.constant 0 : index
    %c0_2 = arith.constant 0 : index
    %0 = vector.load %arg1[%c0, %c0_0, %c0_1, %c0_2] : memref<1x18x18x4xbf16, #tpu.memory_space<vmem>>, vector<1x18x18x4xbf16>
    %1 = vector.extract_strided_slice %0 {offsets = [0, 0, 0, 0], sizes = [1, 18, 16, 4], strides = [1, 1, 1, 1]} : vector<1x18x18x4xbf16> to vector<1x18x16x4xbf16>
    %2 = vector.extract_strided_slice %0 {offsets = [0, 0, 1, 0], sizes = [1, 18, 16, 4], strides = [1, 1, 1, 1]} : vector<1x18x18x4xbf16> to vector<1x18x16x4xbf16>
    %3 = vector.extract_strided_slice %0 {offsets = [0, 0, 2, 0], sizes = [1, 18, 16, 4], strides = [1, 1, 1, 1]} : vector<1x18x18x4xbf16> to vector<1x18x16x4xbf16>
    %4 = tpu.concatenate %1, %2, %3 in 3 : vector<1x18x16x4xbf16>, vector<1x18x16x4xbf16>, vector<1x18x16x4xbf16> -> vector<1x18x16x12xbf16>
    %5 = vector.extract_strided_slice %4 {offsets = [0, 0, 0, 0], sizes = [1, 16, 16, 12], strides = [1, 1, 1, 1]} : vector<1x18x16x12xbf16> to vector<1x16x16x12xbf16>
    %6 = vector.extract_strided_slice %4 {offsets = [0, 1, 0, 0], sizes = [1, 16, 16, 12], strides = [1, 1, 1, 1]} : vector<1x18x16x12xbf16> to vector<1x16x16x12xbf16>
    %7 = vector.extract_strided_slice %4 {offsets = [0, 2, 0, 0], sizes = [1, 16, 16, 12], strides = [1, 1, 1, 1]} : vector<1x18x16x12xbf16> to vector<1x16x16x12xbf16>
    %8 = tpu.concatenate %5, %6, %7 in 3 : vector<1x16x16x12xbf16>, vector<1x16x16x12xbf16>, vector<1x16x16x12xbf16> -> vector<1x16x16x36xbf16>
    %9 = vector.shape_cast %8 : vector<1x16x16x36xbf16> to vector<256x36xbf16>
    %c0_3 = arith.constant 0 : index
    %c0_4 = arith.constant 0 : index
    %10 = vector.load %arg2[%c0_3, %c0_4] : memref<36x8xbf16, #tpu.memory_space<vmem>>, vector<36x8xbf16>
    %cst = arith.constant dense<0.000000e+00> : vector<256x8xf32>
    %11 = tpu.matmul %9, %10, %cst {dimension_numbers = #tpu.dot_dimension_numbers<[1], [0], [0], [1], [0, 0, 1, 1], [], []>} : vector<256x36xbf16>, vector<36x8xbf16>, vector<256x8xf32> -> vector<256x8xf32>
    %c0_5 = arith.constant 0 : index
    %c0_6 = arith.constant 0 : index
    %12 = vector.load %arg3[%c0_5, %c0_6] : memref<1x8xf32, #tpu.memory_space<vmem>>, vector<1x8xf32>
    %13 = vector.broadcast %12 : vector<1x8xf32> to vector<256x8xf32>
    %14 = arith.mulf %11, %13 : vector<256x8xf32>
    %c0_7 = arith.constant 0 : index
    %c0_8 = arith.constant 0 : index
    %15 = vector.load %arg4[%c0_7, %c0_8] : memref<1x8xf32, #tpu.memory_space<vmem>>, vector<1x8xf32>
    %16 = vector.broadcast %15 : vector<1x8xf32> to vector<256x8xf32>
    %17 = arith.addf %14, %16 : vector<256x8xf32>
    %cst_9 = arith.constant 0.000000e+00 : f32
    %18 = vector.broadcast %cst_9 : f32 to vector<256x8xf32>
    %19 = arith.cmpf oge, %17, %18 : vector<256x8xf32>
    %cst_10 = arith.constant 0.00999999977 : f32
    %20 = vector.broadcast %cst_10 : f32 to vector<256x8xf32>
    %21 = arith.mulf %20, %17 : vector<256x8xf32>
    %22 = arith.select %19, %17, %21 : vector<256x8xi1>, vector<256x8xf32>
    %23 = vector.shape_cast %22 : vector<256x8xf32> to vector<1x256x8xf32>
    %24 = tpu.transpose %23, [0, 2, 1] : vector<1x256x8xf32> -> vector<1x8x256xf32>
    %c0_11 = arith.constant 0 : index
    %c0_12 = arith.constant 0 : index
    %c0_13 = arith.constant 0 : index
    %25 = vector.load %arg5[%c0_11, %c0_12, %c0_13] : memref<1x8x256xf32, #tpu.memory_space<vmem>>, vector<1x8x256xf32>
    tpu.vector_store %arg5[%c0_11, %c0_12, %c0_13], %24 {strides = array<i32>} : memref<1x8x256xf32, #tpu.memory_space<vmem>>, vector<1x8x256xf32>,
    return
  }
  func.func @transform_0(%arg0: i32) -> (i32, i32, i32, i32) {
    %c0_i32 = arith.constant 0 : i32
    %c0_i32_0 = arith.constant 0 : i32
    %c0_i32_1 = arith.constant 0 : i32
    %c0_i32_2 = arith.constant 0 : i32
    return %arg0, %c0_i32, %c0_i32_0, %c0_i32_1 : i32, i32, i32, i32
  }
  func.func @transform_1(%arg0: i32) -> (i32, i32) {
    %c0_i32 = arith.constant 0 : i32
    %c0_i32_0 = arith.constant 0 : i32
    %c0_i32_1 = arith.constant 0 : i32
    return %c0_i32, %c0_i32_0 : i32, i32
  }
  func.func @transform_2(%arg0: i32) -> (i32, i32) {
    %c0_i32 = arith.constant 0 : i32
    %c0_i32_0 = arith.constant 0 : i32
    %c0_i32_1 = arith.constant 0 : i32
    return %c0_i32, %c0_i32_0 : i32, i32
  }
  func.func @transform_3(%arg0: i32) -> (i32, i32) {
    %c0_i32 = arith.constant 0 : i32
    %c0_i32_0 = arith.constant 0 : i32
    %c0_i32_1 = arith.constant 0 : i32
    return %c0_i32, %c0_i32_0 : i32, i32
  }
  func.func @transform_4(%arg0: i32) -> (i32, i32, i32) {
    %c0_i32 = arith.constant 0 : i32
    %c0_i32_0 = arith.constant 0 : i32
    %c0_i32_1 = arith.constant 0 : i32
    return %arg0, %c0_i32, %c0_i32_0 : i32, i32, i32
  }
}

</mosaic_0001>

<bundles_post_ra>
// kernel: conv_dropout_norm_nonlin.2
= control target key start
LH: loop header
LB: loop body
LE: loop exit
PB: predicated region body
PF: predicated region fallthrough
CT: control target
= control target key end

     0   :  { %s1648_s12 = smov 0   ;;  %s2320_s0 = inlined_call_operand.vmem [shape: bf16[2,18,18,4], index: 0, kind: input, shape index: {}]   ;;  %s2321_s1 = inlined_call_operand.vmem [shape: bf16[36,8], index: 1, kind: input, shape index: {}]   ;;  %s2322_s2 = inlined_call_operand.vmem [shape: f32[2,1,8], index: 2, kind: output, shape index: {0}]   ;;  %s2323_s3 = inlined_call_operand.vmem [shape: f32[2,1,8], index: 3, kind: output, shape index: {1}]  }
   0x1 LB: > { %s1436_s13 = sadd.s32 4294967295, %s1622_s12   ;;  %p1440_p0 = scmp.ge.s32.totalorder %s1622_s12, 1  ;;  %s1622_s12 = sphi %s1648_s12, %s14_s12  }
   0x2   : > { %p140_p1 = scmp.lt.s32.totalorder %s1622_s12, 3 }
   0x4   : > { %p141_p2 = pnand %p1440_p0, %p140_p1 }
   0x5   : > { %p165_p3 = scmp.lt.s32.totalorder (!%p141_p2), %s1436_s13, 1  ;;  %vm628_vm0 = vcmask (!%p141_p2), 1046528   ;;  %vm375_vm1 = vsmask.f32 (!%p141_p2), 7424  ;;  %s1624_s18 = smov (!%p141_p2), 8   ;;  %vm993_vm2 = vcmask (!%p141_p2), 1041408  }
   0x6   : > { %144 = sbr.rel (%p141_p2) target bundleno = 648 (0x288), region = 28  ;;  %s1625_s19 = smov (!%p141_p2), 4   ;;  %vm719_vm3 = vcmask (!%p141_p2), 31744   ;;  %vm756_vm4 = vcmask (!%p141_p2), 64512   ;;  %vm874_vm5 = vcmask (!%p141_p2), 97280   ;;  %vm907_vm6 = vcmask (!%p141_p2), 195584  }
   0x7   : > { %s1626_s26 = smov (!%p141_p2), 12   ;;  %s1627_s27 = smov (!%p141_p2), 24   ;;  %vm960_vm7 = vcmask (!%p141_p2), 293888   ;;  %vm1361_vm8 = vcmask (!%p141_p2), 57344  }
   0xd   : > { %s2325_s13 = smov (!%p165_p3, %s1436_s13), 1 }
   0xe   : > { %s1564_s14 = smul.u32 216, %s2325_s13  ;;  %s172_s30 = scalar_lea.vmem %s2322_s2, %s2325_s13 }
   0xf   : > { %s175_s6 = scalar_lea.vmem %s2323_s3, %s2325_s13 }
  0x10   : > { %s1662_s17 = scalar_lea.vmem %s2320_s0, %s1564_s14 }
  0x11   : > { %v1665_v0 = vld [vmem:[%s1662_s17 + $0x18] sm:$0xff]   ;;  %v1578_v1 = vld [vmem:[%s1662_s17 + $0x20] ss:$0 sps:$4 sm:$0x11]   ;;  %v1669_v2 = vld [vmem:[%s1662_s17 + $0xc] sm:$0xff]  }
  0x12   : > { %v635_v3 = vrot.slane %v1665_v0, 1  ;;  %v636_v4 = vrot.slane %v1578_v1, 1  ;;  %v1580_v5 = vld [vmem:[%s1662_s17 + $0x14] ss:$0 sps:$4 sm:$0x11]   ;;  %v632_v7 = vrot.slane %v1669_v2, 1 }
  0x13   : > { %v1674_v6 = vld [vmem:[%s1662_s17 + $0x30] sm:$0xff]   ;;  %v1678_v8 = vld [vmem:[%s1662_s17 + $0x24] sm:$0xff]   ;;  %v633_v10 = vrot.slane %v1580_v5, 1  ;;  %v1582_v11 = vld [vmem:[%s1662_s17 + $0x38] ss:$0 sps:$4 sm:$0x11]  }
  0x14   : > { %v637_v9 = vsel %vm628_vm0, %v635_v3, %v636_v4  ;;  %v641_v12 = vrot.slane %v1674_v6, 1  ;;  %v638_v13 = vrot.slane %v1678_v8, 1  ;;  %v642_v15 = vrot.slane %v1582_v11, 1  ;;  %v1584_v16 = vld [vmem:[%s1662_s17 + $0x2c] ss:$0 sps:$4 sm:$0x11]  }
  0x15   : > { %687 = vrot.lane.b32.xlu0 %v637_v9, %s1624_s18  ;;  %v634_v14 = vsel %vm628_vm0, %v632_v7, %v633_v10  ;;  %v639_v18 = vrot.slane %v1584_v16, 1  ;;  %v1690_v19 = vld [vmem:[%s1662_s17 + $0x3c] sm:$0xff]   ;;  %v1586_v20 = vld [vmem:[%s1662_s17 + $0x44] ss:$0 sps:$4 sm:$0x11]   ;;  %v389_v21 = vshrl.u32 %v1669_v2, 16 }
  0x16   : > { %685 = vrot.lane.b32.xlu1 %v634_v14, %s1624_s18  ;;  %v643_v17 = vsel %vm628_vm0, %v641_v12, %v642_v15  ;;  %v391_v22 = vshll.u32 %v1669_v2, 16  ;;  %v396_v23 = vshll.u32 %v1580_v5, 16  ;;  %v413_v24 = vshrl.u32 %v1678_v8, 16  ;;  %v1703_v34 = vld [vmem:[%s1662_s17 + $0x48] sm:$0xff]   ;;  %v1718_v52 = vld [vmem:[%s1662_s17 + $0x54] sm:$0xff]   ;;  %v1730_v7 = vld [vmem:[%s1662_s17 + $0x60] sm:$0xff]  }
  0x17   : > { %v415_v25 = vshll.u32 %v1678_v8, 16  ;;  %v640_v26 = vsel %vm628_vm0, %v638_v13, %v639_v18  ;;  %v644_v27 = vrot.slane %v1690_v19, 1  ;;  %v645_v28 = vrot.slane %v1586_v20, 1  ;;  %v1708_v39 = vld [vmem:[%s1662_s17 + $0x50] ss:$0 sps:$4 sm:$0x11]  }
  0x18   : > { %v420_v29 = vshll.u32 %v1584_v16, 16  ;;  %v393_v30 = vrot.slane %v391_v22, 1  ;;  %v398_v31 = vrot.slane %v396_v23, 1  ;;  %v401_v33 = vshrl.u32 %v1665_v0, 16  ;;  %v1738_v13 = vld [vmem:[%s1662_s17 + $0x6c] sm:$0xff]  }
  0x19   : > { %691 = vrot.lane.b32.xlu0 %v643_v17, %s1624_s18  ;;  %v417_v32 = vrot.slane %v415_v25, 1  ;;  %v646_v35 = vsel %vm628_vm0, %v644_v27, %v645_v28  ;;  %v403_v37 = vshll.u32 %v1665_v0, 16  ;;  %v408_v38 = vshll.u32 %v1578_v1, 16  ;;  %v1590_v53 = vld [vmem:[%s1662_s17 + $0x5c] ss:$0 sps:$4 sm:$0x11]  }
  0x1a   : > { %689 = vrot.lane.b32.xlu1 %v640_v26, %s1624_s18  ;;  %v422_v36 = vrot.slane %v420_v29, 1  ;;  %v394_v40 = vor.u32 %v393_v30, %v389_v21  ;;  %v437_v42 = vshrl.u32 %v1690_v19, 16  ;;  %v439_v43 = vshll.u32 %v1690_v19, 16  ;;  %v1733_v9 = vld [vmem:[%s1662_s17 + $0x68] ss:$0 sps:$4 sm:$0x11]  }
  0x1b   : > { %v418_v41 = vor.u32 %v417_v32, %v413_v24  ;;  %v405_v44 = vrot.slane %v403_v37, 1  ;;  %v410_v45 = vrot.slane %v408_v38, 1  ;;  %v444_v46 = vshll.u32 %v1586_v20, 16  ;;  %v1594_v23 = vld [vmem:[%s1662_s17 + $0x74] ss:$0 sps:$4 sm:$0x11]  }
  0x1c   : > { %v425_v47 = vshrl.u32 %v1674_v6, 16  ;;  %v399_v48 = vsel %vm375_vm1, %v394_v40, %v398_v31  ;;  %v441_v50 = vrot.slane %v439_v43, 1  ;;  %v427_v51 = vshll.u32 %v1674_v6, 16  ;;  %v1752_v30 = vld [vmem:[%s1662_s17 + $0x78] sm:$0xff]  }
  0x1d   : > { %v423_v49 = vsel %vm375_vm1, %v418_v41, %v422_v36  ;;  %594 = vrot.lane.b32.xlu0 %v399_v48, %s1625_s19  ;;  %v406_v54 = vor.u32 %v405_v44, %v401_v33  ;;  %v446_v55 = vrot.slane %v444_v46, 1  ;;  %v432_v56 = vshll.u32 %v1582_v11, 16  ;;  %v1758_v36 = vld [vmem:[%s1662_s17 + $0x84] sm:$0xff]   ;;  %v1762_v38 = vld [vmem:[%s1662_s17 + $0x80] ss:$0 sps:$4 sm:$0x11]  }
  0x1e   : > { %693 = vrot.lane.b32.xlu1 %v646_v35, %s1624_s18  ;;  %v449_v57 = vshrl.u32 %v1703_v34, 16  ;;  %v442_v58 = vor.u32 %v441_v50, %v437_v42  ;;  %v429_v59 = vrot.slane %v427_v51, 1  ;;  %v451_v60 = vshll.u32 %v1703_v34, 16  ;;  %v1598_v43 = vld [vmem:[%s1662_s17 + $0x8c] ss:$0 sps:$4 sm:$0x11]  }
  0x1f   : > { %v456_v61 = vshll.u32 %v1708_v39, 16  ;;  %v411_v62 = vsel %vm375_vm1, %v406_v54, %v410_v45  ;;  %v434_v63 = vrot.slane %v432_v56, 1  ;;  %v461_v1 = vshrl.u32 %v1718_v52, 16 }
  0x20   : > { %v463_v3 = vshll.u32 %v1718_v52, 16  ;;  %v430_v4 = vor.u32 %v429_v59, %v425_v47  ;;  %v453_v5 = vrot.slane %v451_v60, 1  ;;  %v447_v10 = vsel %vm375_vm1, %v442_v58, %v446_v55  ;;  %v1779_v58 = vld [vmem:[%s1662_s17 + $0x90] sm:$0xff]   ;;  %v1782_v59 = vld [vmem:[%s1662_s17 + $0x9c] sm:$0xff]  }
  0x21   : > { %596 = vrot.lane.b32.xlu0 %v411_v62, %s1625_s19  ;;  %v468_v12 = vshll.u32 %v1590_v53, 16  ;;  %v458_v16 = vrot.slane %v456_v61, 1  ;;  %v647_v17 = vrot.slane %v1703_v34, 1  ;;  %v648_v21 = vrot.slane %v1708_v39, 1 }
  0x22   : > { %598 = vrot.lane.b32.xlu1 %v423_v49, %s1625_s19  ;;  %v465_v11 = vrot.slane %v463_v3, 1  ;;  %v435_v14 = vsel %vm375_vm1, %v430_v4, %v434_v63  ;;  %v454_v15 = vor.u32 %v453_v5, %v449_v57  ;;  %v650_v22 = vrot.slane %v1718_v52, 1  ;;  %v1602_v5 = vld [vmem:[%s1662_s17 + $0xa4] ss:$0 sps:$4 sm:$0x11]  }
  0x23   : > { %v470_v20 = vrot.slane %v468_v12, 1  ;;  %v651_v24 = vrot.slane %v1590_v53, 1  ;;  %v475_v25 = vshll.u32 %v1730_v7, 16  ;;  %v485_v27 = vshrl.u32 %v1738_v13, 16 }
  0x24   : > { %v466_v18 = vor.u32 %v465_v11, %v461_v1  ;;  %v487_v28 = vshll.u32 %v1738_v13, 16  ;;  %v492_v29 = vshll.u32 %v1594_v23, 16  ;;  %v459_v31 = vsel %vm375_vm1, %v454_v15, %v458_v16  ;;  %v1600_v12 = vld [vmem:[%s1662_s17 + $0x98] ss:$0 sps:$4 sm:$0x11]  }
  0x25   : > { %600 = vrot.lane.b32.xlu0 %v435_v14, %s1625_s19  ;;  %v473_v32 = vshrl.u32 %v1730_v7, 16  ;;  %v477_v33 = vrot.slane %v475_v25, 1  ;;  %v480_v35 = vshll.u32 %v1733_v9, 16  ;;  %v649_v39 = vsel %vm628_vm0, %v647_v17, %v648_v21  ;;  %v1805_v25 = vld [vmem:[%s1662_s17 + $0xb4] sm:$0xff]  }
  0x26   : > { %602 = vrot.lane.b32.xlu1 %v447_v10, %s1625_s19  ;;  %v471_v26 = vsel %vm375_vm1, %v466_v18, %v470_v20  ;;  %v489_v37 = vrot.slane %v487_v28, 1  ;;  %v652_v40 = vsel %vm628_vm0, %v650_v22, %v651_v24  ;;  %v494_v42 = vrot.slane %v492_v29, 1  ;;  %v1798_v20 = vld [vmem:[%s1662_s17 + $0xa8] sm:$0xff]  }
  0x27   : > { %v478_v44 = vor.u32 %v477_v33, %v473_v32  ;;  %v482_v45 = vrot.slane %v480_v35, 1  ;;  %v499_v46 = vshll.u32 %v1752_v30, 16  ;;  %v511_v47 = vshll.u32 %v1758_v36, 16  ;;  %v1606_v33 = vld [vmem:[%s1662_s17 + $0xbc] ss:$0 sps:$4 sm:$0x11]  }
  0x28   : > { %v490_v41 = vor.u32 %v489_v37, %v485_v27  ;;  %v653_v48 = vrot.slane %v1730_v7, 1  ;;  %v654_v49 = vrot.slane %v1733_v9, 1  ;;  %v656_v50 = vrot.slane %v1738_v13, 1 }
  0x29   : > { %604 = vrot.lane.b32.xlu0 %v459_v31, %s1625_s19  ;;  %v504_v51 = vshll.u32 %v1762_v38, 16  ;;  %v516_v53 = vshll.u32 %v1598_v43, 16  ;;  %v657_v55 = vrot.slane %v1594_v23, 1  ;;  %v509_v56 = vshrl.u32 %v1758_v36, 16 }
  0x2a   : > { %606 = vrot.lane.b32.xlu1 %v471_v26, %s1625_s19  ;;  %v495_v54 = vsel %vm375_vm1, %v490_v41, %v494_v42  ;;  %v513_v57 = vrot.slane %v511_v47, 1  ;;  %v483_v60 = vsel %vm375_vm1, %v478_v44, %v482_v45  ;;  %v497_v61 = vshrl.u32 %v1752_v30, 16  ;;  %v1810_v31 = vld [vmem:[%s1662_s17 + $0xb0] ss:$0 sps:$4 sm:$0x11]  }
  0x2b   : > { %v501_v62 = vrot.slane %v499_v46, 1  ;;  %v506_v63 = vrot.slane %v504_v51, 1  ;;  %v518_v1 = vrot.slane %v516_v53, 1  ;;  %v658_v3 = vsel %vm628_vm0, %v656_v50, %v657_v55  ;;  %v1827_v53 = vld [vmem:[%s1662_s17] sm:$0xff]  }
  0x2c   : > { %v514_v4 = vor.u32 %v513_v57, %v509_v56  ;;  %v535_v9 = vshll.u32 %v1782_v59, 16  ;;  %v655_v10 = vsel %vm628_vm0, %v653_v48, %v654_v49  ;;  %v523_v14 = vshll.u32 %v1779_v58, 16  ;;  %v1832_v57 = vld [vmem:[%s1662_s17 + $0xc0] sm:$0xff]  }
  0x2d   : > { %695 = vrot.lane.b32.xlu0 %v649_v39, %s1624_s18  ;;  %v502_v11 = vor.u32 %v501_v62, %v497_v61  ;;  %v659_v15 = vrot.slane %v1752_v30, 1  ;;  %v660_v16 = vrot.slane %v1762_v38, 1  ;;  %v662_v17 = vrot.slane %v1758_v36, 1  ;;  %v1610_v61 = vld [vmem:[%s1662_s17 + $0xd4] ss:$0 sps:$4 sm:$0x11]  }
  0x2e   : > { %697 = vrot.lane.b32.xlu1 %v652_v40, %s1624_s18  ;;  %v663_v18 = vrot.slane %v1598_v43, 1  ;;  %v519_v21 = vsel %vm375_vm1, %v514_v4, %v518_v1  ;;  %v533_v22 = vshrl.u32 %v1782_v59, 16  ;;  %v537_v23 = vrot.slane %v535_v9, 1  ;;  %v1612_v9 = vld [vmem:[%s1662_s17 + $0x8] ss:$0 sps:$4 sm:$0x11]  }
  0x2f   : > { %v540_v24 = vshll.u32 %v1602_v5, 16  ;;  %v507_v26 = vsel %vm375_vm1, %v502_v11, %v506_v63  ;;  %v521_v27 = vshrl.u32 %v1779_v58, 16  ;;  %v525_v28 = vrot.slane %v523_v14, 1  ;;  %v1608_v14 = vld [vmem:[%s1662_s17 + $0xc8] ss:$0 sps:$4 sm:$0x11]  }
  0x30   : > { %v528_v29 = vshll.u32 %v1600_v12, 16  ;;  %v547_v32 = vshll.u32 %v1798_v20, 16  ;;  %v664_v35 = vsel %vm628_vm0, %v662_v17, %v663_v18  ;;  %v538_v37 = vor.u32 %v537_v23, %v533_v22 }
  0x31   : > { %608 = vrot.lane.b32.xlu0 %v483_v60, %s1625_s19  ;;  %v542_v38 = vrot.slane %v540_v24, 1  ;;  %v559_v39 = vshll.u32 %v1805_v25, 16  ;;  %v661_v40 = vsel %vm628_vm0, %v659_v15, %v660_v16  ;;  %v526_v41 = vor.u32 %v525_v28, %v521_v27  ;;  %v1835_v60 = vld [vmem:[%s1662_s17 + $0xcc] sm:$0xff]  }
  0x32   : > { %610 = vrot.lane.b32.xlu1 %v495_v54, %s1625_s19  ;;  %v530_v42 = vrot.slane %v528_v29, 1  ;;  %v668_v43 = vrot.slane %v1782_v59, 1  ;;  %v669_v44 = vrot.slane %v1602_v5, 1  ;;  %v545_v45 = vshrl.u32 %v1798_v20, 16 }
  0x33   : > { %v549_v46 = vrot.slane %v547_v32, 1  ;;  %v552_v47 = vshll.u32 %v1810_v31, 16  ;;  %v543_v48 = vsel %vm375_vm1, %v538_v37, %v542_v38  ;;  %v557_v49 = vshrl.u32 %v1805_v25, 16 }
  0x34   : > { %v561_v50 = vrot.slane %v559_v39, 1  ;;  %v564_v51 = vshll.u32 %v1606_v33, 16  ;;  %v531_v54 = vsel %vm375_vm1, %v526_v41, %v530_v42  ;;  %v665_v55 = vrot.slane %v1779_v58, 1 }
  0x35   : > { %699 = vrot.lane.b32.xlu0 %v655_v10, %s1624_s18  ;;  %v666_v56 = vrot.slane %v1600_v12, 1  ;;  %v670_v62 = vsel %vm628_vm0, %v668_v43, %v669_v44  ;;  %v550_v63 = vor.u32 %v549_v46, %v545_v45  ;;  %v554_v1 = vrot.slane %v552_v47, 1 }
  0x36   : > { %701 = vrot.lane.b32.xlu1 %v658_v3, %s1624_s18  ;;  %v680_v3 = vrot.slane %v1835_v60, 1  ;;  %v562_v4 = vor.u32 %v561_v50, %v557_v49  ;;  %v566_v5 = vrot.slane %v564_v51, 1  ;;  %v379_v10 = vshll.u32 %v1827_v53, 16 }
  0x37   : > { %v681_v11 = vrot.slane %v1610_v61, 1  ;;  %v667_v12 = vsel %vm628_vm0, %v665_v55, %v666_v56  ;;  %v571_v15 = vshll.u32 %v1832_v57, 16  ;;  %v671_v16 = vrot.slane %v1798_v20, 1 }
  0x38   : > { %v555_v18 = vsel %vm375_vm1, %v550_v63, %v554_v1  ;;  %v674_v22 = vrot.slane %v1805_v25, 1  ;;  %v675_v23 = vrot.slane %v1606_v33, 1  ;;  %v567_v24 = vsel %vm375_vm1, %v562_v4, %v566_v5  ;;  %v1614_v1 = vld [vmem:[%s2321_s1 + $0x8] sm:$0xff]   ;;  %v1615_v4 = vld [vmem:[%s2321_s1 + $0x10] ss:$0 sps:$4 sm:$0x33]  }
  0x39   : > { %612 = vrot.lane.b32.xlu0 %v507_v26, %s1625_s19  ;;  %v682_v17 = vsel %vm628_vm0, %v680_v3, %v681_v11  ;;  %v377_v26 = vshrl.u32 %v1827_v53, 16  ;;  %v381_v27 = vrot.slane %v379_v10, 1  ;;  %v384_v28 = vshll.u32 %v1612_v9, 16 }
  0x3a   : > { %614 = vrot.lane.b32.xlu1 %v519_v21, %s1625_s19  ;;  %v672_v21 = vrot.slane %v1810_v31, 1  ;;  %v569_v29 = vshrl.u32 %v1832_v57, 16  ;;  %v573_v32 = vrot.slane %v571_v15, 1  ;;  %v583_v37 = vshll.u32 %v1835_v60, 16 }
  0x3b   : > { %v676_v33 = vsel %vm628_vm0, %v674_v22, %v675_v23  ;;  %v581_v38 = vshrl.u32 %v1835_v60, 16  ;;  %v382_v39 = vor.u32 %v381_v27, %v377_v26  ;;  %v588_v44 = vshll.u32 %v1610_v61, 16  ;;  %v1613_v61 = vld [vmem:[%s2321_s1] sm:$0xff]  }
  0x3c   : > { %v673_v31 = vsel %vm628_vm0, %v671_v16, %v672_v21  ;;  %v574_v41 = vor.u32 %v573_v32, %v569_v29  ;;  %v585_v43 = vrot.slane %v583_v37, 1  ;;  %v677_v46 = vrot.slane %v1832_v57, 1  ;;  %1518 = vmatprep.subr.bf16.mxu0 %v1613_v61  ;;  %1556 = vmatprep.subr.bf16.mxu1 %v1613_v61 }
  0x3d   : > { %703 = vrot.lane.b32.xlu0 %v661_v40, %s1624_s18  ;;  %v386_v40 = vrot.slane %v384_v28, 1  ;;  %v678_v47 = vrot.slane %v1608_v14, 1  ;;  %v590_v50 = vrot.slane %v588_v44, 1  ;;  %v629_v55 = vrot.slane %v1827_v53, 1  ;;  %1519 = vmatpush3.bf16.msra.mxu0 %v1613_v61 }
  0x3e   : > { %705 = vrot.lane.b32.xlu1 %v664_v35, %s1624_s18  ;;  %v576_v35 = vshll.u32 %v1608_v14, 16  ;;  %v586_v49 = vor.u32 %v585_v43, %v581_v38  ;;  %v630_v56 = vrot.slane %v1612_v9, 1  ;;  %1559 = vmatpush3.bf16.msra.mxu1 %v1613_v61  ;;  %v995_v10 = vsel %vm993_vm2, %v1615_v4, 0 }
  0x3f   : > { %v387_v45 = vsel %vm375_vm1, %v382_v39, %v386_v40  ;;  %v679_v51 = vsel %vm628_vm0, %v677_v46, %v678_v47  ;;  %1520 = vmatprep.subr.bf16.mxu0 %v1614_v1  ;;  %1557 = vmatprep.subr.bf16.mxu1 %v1614_v1 }
  0x40   : > { %v578_v42 = vrot.slane %v576_v35, 1 }
  0x41   : > { %616 = vrot.lane.b32.xlu0 %v531_v54, %s1625_s19  ;;  %v591_v54 = vsel %vm375_vm1, %v586_v49, %v590_v50  ;;  %1521 = vmatpush3.bf16.msra.mxu0 %v1614_v1 }
  0x42   : > { %618 = vrot.lane.b32.xlu1 %v543_v48, %s1625_s19  ;;  %v579_v48 = vsel %vm375_vm1, %v574_v41, %v578_v42  ;;  %1560 = vmatpush3.bf16.msra.mxu1 %v1614_v1 }
  0x43   : > { %1562 = vmatprep.subr.msk.bf16.mxu0 %vm993_vm2, %v1615_v4  ;;  %1563 = vmatprep.subr.msk.bf16.mxu1 %vm993_vm2, %v1615_v4 }
  0x45   : > { %707 = vrot.lane.b32.xlu0 %v667_v12, %s1624_s18  ;;  %1523 = vmatpush3.bf16.msra.mxu0 %v995_v10 }
  0x46   : > { %709 = vrot.lane.b32.xlu1 %v670_v62, %s1624_s18  ;;  %v631_v62 = vsel %vm628_vm0, %v629_v55, %v630_v56  ;;  %1561 = vmatpush3.bf16.msra.mxu1 %v995_v10 }
  0x49   : > { %620 = vrot.lane.b32.xlu0 %v555_v18, %s1625_s19 }
  0x4a   : > { %622 = vrot.lane.b32.xlu1 %v567_v24, %s1625_s19 }
  0x4d   : > { %711 = vrot.lane.b32.xlu0 %v673_v31, %s1624_s18 }
  0x4e   : > { %713 = vrot.lane.b32.xlu1 %v676_v33, %s1624_s18 }
  0x51   : > { %624 = vrot.lane.b32.xlu0 %v579_v48, %s1625_s19 }
  0x52   : > { %592 = vrot.lane.b32.xlu1 %v387_v45, %s1625_s19 }
  0x55   : > { %626 = vrot.lane.b32.xlu0 %v591_v54, %s1625_s19 }
  0x56   : > { %715 = vrot.lane.b32.xlu1 %v679_v51, %s1624_s18 }
  0x59   : > { %683 = vrot.lane.b32.xlu0 %v631_v62, %s1624_s18 }
  0x5a   : > { %717 = vrot.lane.b32.xlu1 %v682_v17, %s1624_s18 }
  0x87   : > { %v688_v63 = vpop.permute.xlu0 %687 }
  0x88   : > { %v686_v3 = vpop.permute.xlu1 %685 }
  0x8b   : > { %v692_v5 = vpop.permute.xlu0 %691 }
  0x8c   : > { %v690_v9 = vpop.permute.xlu1 %689 }
  0x8f   : > { %v595_v12 = vpop.permute.xlu0 %594 }
  0x90   : > { %v694_v11 = vpop.permute.xlu1 %693  ;;  %v723_v14 = vsel %vm719_vm3, %v1669_v2, %v595_v12 }
  0x91   : > { %v1890_v15 = vsel %vm756_vm4, %v723_v14, %v686_v3 }
  0x92   : > { %809 = vrot.lane.b32.xlu0 %v1890_v15, %s1626_s26 }
  0x93   : > { %v597_v17 = vpop.permute.xlu0 %596 }
  0x94   : > { %v599_v16 = vpop.permute.xlu1 %598  ;;  %v725_v18 = vsel %vm719_vm3, %v1665_v0, %v597_v17 }
  0x95   : > { %v1897_v21 = vsel %vm756_vm4, %v725_v18, %v688_v63  ;;  %v727_v22 = vsel %vm719_vm3, %v1678_v8, %v599_v16 }
  0x96   : > { %842 = vrot.lane.b32.xlu0 %v1897_v21, %s1627_s27  ;;  %811 = vrot.lane.b32.xlu1 %v1897_v21, %s1626_s26  ;;  %v1906_v24 = vsel %vm756_vm4, %v727_v22, %v690_v9 }
  0x97   : > { %v601_v23 = vpop.permute.xlu0 %600 }
  0x98   : > { %v603_v2 = vpop.permute.xlu1 %602  ;;  %v729_v0 = vsel %vm719_vm3, %v1674_v6, %v601_v23 }
  0x99   : > { %v1915_v27 = vsel %vm756_vm4, %v729_v0, %v692_v5  ;;  %v731_v28 = vsel %vm719_vm3, %v1690_v19, %v603_v2 }
  0x9a   : > { %813 = vrot.lane.b32.xlu0 %v1906_v24, %s1626_s26  ;;  %844 = vrot.lane.b32.xlu1 %v1906_v24, %s1627_s27  ;;  %v1924_v32 = vsel %vm756_vm4, %v731_v28, %v694_v11 }
  0x9b   : > { %v605_v26 = vpop.permute.xlu0 %604 }
  0x9c   : > { %v607_v8 = vpop.permute.xlu1 %606  ;;  %v733_v35 = vsel %vm719_vm3, %v1703_v34, %v605_v26 }
  0x9d   : > { %v735_v33 = vsel %vm719_vm3, %v1718_v52, %v607_v8 }
  0x9e   : > { %846 = vrot.lane.b32.xlu0 %v1915_v27, %s1627_s27  ;;  %815 = vrot.lane.b32.xlu1 %v1915_v27, %s1626_s26 }
  0x9f   : > { %v696_v29 = vpop.permute.xlu0 %695 }
  0xa0   : > { %v698_v6 = vpop.permute.xlu1 %697  ;;  %v1933_v31 = vsel %vm756_vm4, %v733_v35, %v696_v29 }
  0xa1   : > { %v1942_v39 = vsel %vm756_vm4, %v735_v33, %v698_v6 }
  0xa2   : > { %817 = vrot.lane.b32.xlu0 %v1924_v32, %s1626_s26  ;;  %848 = vrot.lane.b32.xlu1 %v1924_v32, %s1627_s27 }
  0xa3   : > { %v609_v37 = vpop.permute.xlu0 %608 }
  0xa4   : > { %v611_v19 = vpop.permute.xlu1 %610  ;;  %v737_v40 = vsel %vm719_vm3, %v1730_v7, %v609_v37 }
  0xa5   : > { %v739_v43 = vsel %vm719_vm3, %v1738_v13, %v611_v19 }
  0xa6   : > { %850 = vrot.lane.b32.xlu0 %v1933_v31, %s1627_s27  ;;  %819 = vrot.lane.b32.xlu1 %v1933_v31, %s1626_s26 }
  0xa7   : > { %v700_v38 = vpop.permute.xlu0 %699 }
  0xa8   : > { %v702_v34 = vpop.permute.xlu1 %701  ;;  %v1951_v42 = vsel %vm756_vm4, %v737_v40, %v700_v38 }
  0xa9   : > { %v1960_v45 = vsel %vm756_vm4, %v739_v43, %v702_v34 }
  0xaa   : > { %821 = vrot.lane.b32.xlu0 %v1942_v39, %s1626_s26  ;;  %852 = vrot.lane.b32.xlu1 %v1942_v39, %s1627_s27 }
  0xab   : > { %v613_v41 = vpop.permute.xlu0 %612 }
  0xac   : > { %v615_v52 = vpop.permute.xlu1 %614  ;;  %v741_v46 = vsel %vm719_vm3, %v1752_v30, %v613_v41 }
  0xad   : > { %v743_v49 = vsel %vm719_vm3, %v1758_v36, %v615_v52 }
  0xae   : > { %854 = vrot.lane.b32.xlu0 %v1951_v42, %s1627_s27  ;;  %823 = vrot.lane.b32.xlu1 %v1951_v42, %s1626_s26 }
  0xaf   : > { %v704_v44 = vpop.permute.xlu0 %703 }
  0xb0   : > { %v706_v7 = vpop.permute.xlu1 %705  ;;  %v1969_v48 = vsel %vm756_vm4, %v741_v46, %v704_v44 }
  0xb1   : > { %v1978_v51 = vsel %vm756_vm4, %v743_v49, %v706_v7 }
  0xb2   : > { %825 = vrot.lane.b32.xlu0 %v1960_v45, %s1626_s26  ;;  %856 = vrot.lane.b32.xlu1 %v1960_v45, %s1627_s27 }
  0xb3   : > { %v617_v47 = vpop.permute.xlu0 %616 }
  0xb4   : > { %v619_v13 = vpop.permute.xlu1 %618  ;;  %v745_v54 = vsel %vm719_vm3, %v1779_v58, %v617_v47 }
  0xb5   : > { %v747_v61 = vsel %vm719_vm3, %v1782_v59, %v619_v13 }
  0xb6   : > { %858 = vrot.lane.b32.xlu0 %v1969_v48, %s1627_s27  ;;  %827 = vrot.lane.b32.xlu1 %v1969_v48, %s1626_s26 }
  0xb7   : > { %v708_v50 = vpop.permute.xlu0 %707 }
  0xb8   : > { %v710_v30 = vpop.permute.xlu1 %709  ;;  %v1987_v56 = vsel %vm756_vm4, %v745_v54, %v708_v50 }
  0xb9   : > { %v1996_v63 = vsel %vm756_vm4, %v747_v61, %v710_v30 }
  0xba   : > { %829 = vrot.lane.b32.xlu0 %v1978_v51, %s1626_s26  ;;  %860 = vrot.lane.b32.xlu1 %v1978_v51, %s1627_s27 }
  0xbb   : > { %v621_v55 = vpop.permute.xlu0 %620 }
  0xbc   : > { %v623_v36 = vpop.permute.xlu1 %622  ;;  %v749_v1 = vsel %vm719_vm3, %v1798_v20, %v621_v55 }
  0xbd   : > { %v751_v5 = vsel %vm719_vm3, %v1805_v25, %v623_v36 }
  0xbe   : > { %862 = vrot.lane.b32.xlu0 %v1987_v56, %s1627_s27  ;;  %831 = vrot.lane.b32.xlu1 %v1987_v56, %s1626_s26 }
  0xbf   : > { %v712_v62 = vpop.permute.xlu0 %711 }
  0xc0   : > { %v714_v58 = vpop.permute.xlu1 %713  ;;  %v2005_v4 = vsel %vm756_vm4, %v749_v1, %v712_v62 }
  0xc1   : > { %v2016_v10 = vsel %vm756_vm4, %v751_v5, %v714_v58 }
  0xc2   : > { %833 = vrot.lane.b32.xlu0 %v1996_v63, %s1626_s26  ;;  %864 = vrot.lane.b32.xlu1 %v1996_v63, %s1627_s27 }
  0xc3   : > { %v625_v3 = vpop.permute.xlu0 %624 }
  0xc4   : > { %v593_v59 = vpop.permute.xlu1 %592  ;;  %v753_v9 = vsel %vm719_vm3, %v1832_v57, %v625_v3 }
  0xc5   : > { %v721_v18 = vsel %vm719_vm3, %v1827_v53, %v593_v59 }
  0xc6   : > { %866 = vrot.lane.b32.xlu0 %v2005_v4, %s1627_s27  ;;  %835 = vrot.lane.b32.xlu1 %v2005_v4, %s1626_s26 }
  0xc7   : > { %v627_v25 = vpop.permute.xlu0 %626 }
  0xc8   : > { %v716_v20 = vpop.permute.xlu1 %715  ;;  %v755_v12 = vsel %vm719_vm3, %v1835_v60, %v627_v25 }
  0xc9   : > { %v790_v11 = vsel %vm756_vm4, %v753_v9, %v716_v20 }
  0xca   : > { %837 = vrot.lane.b32.xlu0 %v2016_v10, %s1626_s26  ;;  %868 = vrot.lane.b32.xlu1 %v2016_v10, %s1627_s27 }
  0xcb   : > { %v684_v16 = vpop.permute.xlu0 %683 }
  0xcc   : > { %v718_v14 = vpop.permute.xlu1 %717  ;;  %v758_v22 = vsel %vm756_vm4, %v721_v18, %v684_v16 }
  0xcd   : > { %v792_v57 = vsel %vm756_vm4, %v755_v12, %v718_v14 }
  0xce   : > { %870 = vrot.lane.b32.xlu0 %v790_v11, %s1627_s27  ;;  %839 = vrot.lane.b32.xlu1 %v790_v11, %s1626_s26 }
  0xd2   : > { %872 = vrot.lane.b32.xlu1 %v792_v57, %s1627_s27 }
 0x104   : > { %v810_v17 = vpop.permute.xlu0 %809 }
 0x105   : > { %v876_v60 = vsel %vm874_vm5, %v758_v22, %v810_v17 }
 0x108   : > { %v843_v2 = vpop.permute.xlu0 %842  ;;  %v812_v23 = vpop.permute.xlu1 %811 }
 0x109   : > { %v909_v0 = vsel %vm907_vm6, %v876_v60, %v843_v2  ;;  %v878_v8 = vsel %vm874_vm5, %v1890_v15, %v812_v23 }
 0x10a   : > { %1524 = vmatprep.mubr.msk.bf16.mxu0 %vm960_vm7, %v909_v0 }
 0x10c   : > { %v814_v26 = vpop.permute.xlu0 %813  ;;  %v845_v28 = vpop.permute.xlu1 %844 }
 0x10d   : > { %v911_v6 = vsel %vm907_vm6, %v878_v8, %v845_v28  ;;  %v880_v53 = vsel %vm874_vm5, %v1897_v21, %v814_v26 }
 0x10e   : > { %1525 = vmatmul.mubr.msk.bf16.vlgmr.msra.gmra.mrb[0].mxu0 %vm960_vm7, %v911_v6 }
 0x110   : > { %v847_v29 = vpop.permute.xlu0 %846  ;;  %v816_v35 = vpop.permute.xlu1 %815 }
 0x111   : > { %v913_v19 = vsel %vm907_vm6, %v880_v53, %v847_v29  ;;  %v882_v37 = vsel %vm874_vm5, %v1906_v24, %v816_v35 }
 0x112   : > { %1528 = vmatprep.mubr.msk.bf16.mxu0 %vm960_vm7, %v913_v19 }
 0x114   : > { %v818_v33 = vpop.permute.xlu0 %817  ;;  %v849_v15 = vpop.permute.xlu1 %848 }
 0x115   : > { %v915_v34 = vsel %vm907_vm6, %v882_v37, %v849_v15  ;;  %v884_v38 = vsel %vm874_vm5, %v1915_v27, %v818_v33 }
 0x116   : > { %1529 = vmatmul.mubr.msk.bf16.gmra.mrb[4].mxu0 %vm960_vm7, %v915_v34 }
 0x118   : > { %v851_v40 = vpop.permute.xlu0 %850  ;;  %v820_v21 = vpop.permute.xlu1 %819 }
 0x119   : > { %v917_v52 = vsel %vm907_vm6, %v884_v38, %v851_v40  ;;  %v886_v41 = vsel %vm874_vm5, %v1924_v32, %v820_v21 }
 0x11a   : > { %1532 = vmatprep.mubr.msk.bf16.mxu0 %vm960_vm7, %v917_v52 }
 0x11c   : > { %v822_v43 = vpop.permute.xlu0 %821  ;;  %v853_v24 = vpop.permute.xlu1 %852 }
 0x11d   : > { %v919_v7 = vsel %vm907_vm6, %v886_v41, %v853_v24  ;;  %v888_v44 = vsel %vm874_vm5, %v1933_v31, %v822_v43 }
 0x11e   : > { %1533 = vmatmul.mubr.msk.bf16.gmra.mrb[8].mxu0 %vm960_vm7, %v919_v7 }
 0x120   : > { %v855_v46 = vpop.permute.xlu0 %854  ;;  %v824_v27 = vpop.permute.xlu1 %823 }
 0x121   : > { %v921_v13 = vsel %vm907_vm6, %v888_v44, %v855_v46  ;;  %v890_v47 = vsel %vm874_vm5, %v1942_v39, %v824_v27 }
 0x122   : > { %1536 = vmatprep.mubr.msk.bf16.mxu0 %vm960_vm7, %v921_v13 }
 0x124   : > { %v826_v49 = vpop.permute.xlu0 %825  ;;  %v857_v32 = vpop.permute.xlu1 %856 }
 0x125   : > { %v923_v30 = vsel %vm907_vm6, %v890_v47, %v857_v32  ;;  %v892_v50 = vsel %vm874_vm5, %v1951_v42, %v826_v49 }
 0x126   : > { %1537 = vmatmul.mubr.msk.bf16.gmra.mrb[12].mxu0 %vm960_vm7, %v923_v30 }
 0x128   : > { %v859_v54 = vpop.permute.xlu0 %858  ;;  %v828_v31 = vpop.permute.xlu1 %827 }
 0x129   : > { %v925_v36 = vsel %vm907_vm6, %v892_v50, %v859_v54  ;;  %v894_v55 = vsel %vm874_vm5, %v1960_v45, %v828_v31 }
 0x12a   : > { %1540 = vmatprep.mubr.msk.bf16.mxu1 %vm960_vm7, %v925_v36 }
 0x12c   : > { %v830_v61 = vpop.permute.xlu0 %829  ;;  %v861_v39 = vpop.permute.xlu1 %860 }
 0x12d   : > { %v927_v58 = vsel %vm907_vm6, %v894_v55, %v861_v39  ;;  %v896_v62 = vsel %vm874_vm5, %v1969_v48, %v830_v61 }
 0x12e   : > { %1541 = vmatmul.mubr.msk.bf16.vlgmr.msra.gmra.mrb[0].mxu1 %vm960_vm7, %v927_v58 }
 0x130   : > { %v863_v1 = vpop.permute.xlu0 %862  ;;  %v832_v42 = vpop.permute.xlu1 %831 }
 0x131   : > { %v929_v59 = vsel %vm907_vm6, %v896_v62, %v863_v1  ;;  %v898_v3 = vsel %vm874_vm5, %v1978_v51, %v832_v42 }
 0x132   : > { %1544 = vmatprep.mubr.msk.bf16.mxu1 %vm960_vm7, %v929_v59 }
 0x134   : > { %v834_v5 = vpop.permute.xlu0 %833  ;;  %v865_v45 = vpop.permute.xlu1 %864 }
 0x135   : > { %v931_v20 = vsel %vm907_vm6, %v898_v3, %v865_v45  ;;  %v900_v9 = vsel %vm874_vm5, %v1987_v56, %v834_v5 }
 0x136   : > { %1545 = vmatmul.mubr.msk.bf16.gmra.mrb[4].mxu1 %vm960_vm7, %v931_v20 }
 0x138   : > { %v867_v25 = vpop.permute.xlu0 %866  ;;  %v836_v48 = vpop.permute.xlu1 %835 }
 0x139   : > { %v933_v11 = vsel %vm907_vm6, %v900_v9, %v867_v25  ;;  %v902_v12 = vsel %vm874_vm5, %v1996_v63, %v836_v48 }
 0x13a   : > { %1548 = vmatprep.mubr.msk.bf16.mxu1 %vm960_vm7, %v933_v11 }
 0x13c   : > { %v838_v14 = vpop.permute.xlu0 %837  ;;  %v869_v51 = vpop.permute.xlu1 %868 }
 0x13d   : > { %v935_v57 = vsel %vm907_vm6, %v902_v12, %v869_v51  ;;  %v904_v16 = vsel %vm874_vm5, %v2005_v4, %v838_v14 }
 0x13e   : > { %1549 = vmatmul.mubr.msk.bf16.gmra.mrb[8].mxu1 %vm960_vm7, %v935_v57 }
 0x140   : > { %v871_v17 = vpop.permute.xlu0 %870  ;;  %v840_v56 = vpop.permute.xlu1 %839 }
 0x141   : > { %v937_v18 = vsel %vm907_vm6, %v904_v16, %v871_v17  ;;  %v906_v22 = vsel %vm874_vm5, %v2016_v10, %v840_v56 }
 0x142   : > { %1552 = vmatprep.mubr.msk.bf16.mxu1 %vm960_vm7, %v937_v18 }
 0x144   : > { %v873_v60 = vpop.permute.xlu1 %872 }
 0x145   : > { %v939_v63 = vsel %vm907_vm6, %v906_v22, %v873_v60 }
 0x146   : > { %1553 = vmatmul.mubr.msk.bf16.gmra.mrb[12].mxu1 %vm960_vm7, %v939_v63 }
 0x1e1   : > { %v2095_v2 = vpop.f32.mrb[0].mxu0 }
 0x1e2   : > { %v2097_v23 = vpop.f32.mrb[1].mxu0  ;;  %v1161_v28 = vsel %vm756_vm4, %v2095_v2, 0.0 }
 0x1e3   : > { %v2099_v0 = vpop.f32.mrb[2].mxu0  ;;  %v1158_v8 = vsel %vm756_vm4, %v2097_v23, 0.0 }
 0x1e4   : > { %v2101_v4 = vpop.f32.mrb[3].mxu0  ;;  %v1163_v53 = vsel %vm756_vm4, %v2099_v0, 0.0 }
 0x1e5   : > { %v1159_v26 = vsel %vm756_vm4, %v2101_v4, 0.0 }
 0x1e6   : > { %v1160_v10 = vadd.f32 %v1159_v26, %v1158_v8 }
 0x1e8   : > { %v1162_v6 = vadd.f32 %v1161_v28, %v1160_v10 }
 0x1e9   : > { %v2111_v29 = vpop.f32.mrb[4].mxu0 }
 0x1ea   : > { %v2113_v35 = vpop.f32.mrb[5].mxu0  ;;  %v1164_v19 = vadd.f32 %v1163_v53, %v1162_v6  ;;  %v1169_v21 = vsel %vm756_vm4, %v2111_v29, 0.0 }
 0x1eb   : > { %v1165_v37 = vsel %vm756_vm4, %v2113_v35, 0.0  ;;  %v2117_v33 = vpop.f32.mrb[6].mxu0 }
 0x1ec   : > { %v1166_v15 = vadd.f32 %v1165_v37, %v1164_v19  ;;  %v2119_v34 = vpop.f32.mrb[7].mxu0  ;;  %v1171_v41 = vsel %vm756_vm4, %v2117_v33, 0.0 }
 0x1ed   : > { %v1167_v38 = vsel %vm756_vm4, %v2119_v34, 0.0 }
 0x1ee   : > { %v1168_v40 = vadd.f32 %v1167_v38, %v1166_v15 }
 0x1f0   : > { %v1170_v52 = vadd.f32 %v1169_v21, %v1168_v40 }
 0x1f1   : > { %v2127_v43 = vpop.f32.mrb[8].mxu0 }
 0x1f2   : > { %v2129_v24 = vpop.f32.mrb[9].mxu0  ;;  %v1172_v7 = vadd.f32 %v1171_v41, %v1170_v52  ;;  %v1177_v32 = vsel %vm756_vm4, %v2127_v43, 0.0 }
 0x1f3   : > { %v1173_v44 = vsel %vm756_vm4, %v2129_v24, 0.0  ;;  %v2133_v46 = vpop.f32.mrb[10].mxu0 }
 0x1f4   : > { %v1174_v27 = vadd.f32 %v1173_v44, %v1172_v7  ;;  %v2135_v13 = vpop.f32.mrb[11].mxu0  ;;  %v1179_v50 = vsel %vm756_vm4, %v2133_v46, 0.0 }
 0x1f5   : > { %v1175_v47 = vsel %vm756_vm4, %v2135_v13, 0.0 }
 0x1f6   : > { %v1176_v49 = vadd.f32 %v1175_v47, %v1174_v27 }
 0x1f8   : > { %v1178_v30 = vadd.f32 %v1177_v32, %v1176_v49 }
 0x1f9   : > { %v2143_v54 = vpop.f32.mrb[12].mxu0 }
 0x1fa   : > { %v2145_v31 = vpop.f32.mrb[13].mxu0  ;;  %v1180_v36 = vadd.f32 %v1179_v50, %v1178_v30  ;;  %v1185_v42 = vsel %vm756_vm4, %v2143_v54, 0.0 }
 0x1fb   : > { %v1181_v55 = vsel %vm756_vm4, %v2145_v31, 0.0  ;;  %v2149_v61 = vpop.f32.mrb[14].mxu0 }
 0x1fc   : > { %v1182_v39 = vadd.f32 %v1181_v55, %v1180_v36  ;;  %v2151_v58 = vpop.f32.mrb[15].mxu0  ;;  %v1187_v3 = vsel %vm756_vm4, %v2149_v61, 0.0 }
 0x1fd   : > { %v1183_v62 = vsel %vm756_vm4, %v2151_v58, 0.0 }
 0x1fe   : > { %v1184_v1 = vadd.f32 %v1183_v62, %v1182_v39 }
 0x200   : > { %v1186_v59 = vadd.f32 %v1185_v42, %v1184_v1 }
 0x201   : > { %v2159_v5 = vpop.f32.mrb[0].mxu1 }
 0x202   : > { %v2161_v45 = vpop.f32.mrb[1].mxu1  ;;  %v1188_v20 = vadd.f32 %v1187_v3, %v1186_v59  ;;  %v1193_v51 = vsel %vm756_vm4, %v2159_v5, 0.0 }
 0x203   : > { %v1189_v9 = vsel %vm756_vm4, %v2161_v45, 0.0  ;;  %v2165_v25 = vpop.f32.mrb[2].mxu1 }
 0x204   : > { %v1190_v48 = vadd.f32 %v1189_v9, %v1188_v20  ;;  %v2167_v11 = vpop.f32.mrb[3].mxu1  ;;  %v1195_v16 = vsel %vm756_vm4, %v2165_v25, 0.0 }
 0x205   : > { %v1191_v12 = vsel %vm756_vm4, %v2167_v11, 0.0 }
 0x206   : > { %v1192_v14 = vadd.f32 %v1191_v12, %v1190_v48 }
 0x208   : > { %v1194_v57 = vadd.f32 %v1193_v51, %v1192_v14 }
 0x209   : > { %v2175_v17 = vpop.f32.mrb[4].mxu1 }
 0x20a   : > { %v2177_v56 = vpop.f32.mrb[5].mxu1  ;;  %v1196_v18 = vadd.f32 %v1195_v16, %v1194_v57  ;;  %v1201_v28 = vsel %vm756_vm4, %v2175_v17, 0.0 }
 0x20b   : > { %v1197_v22 = vsel %vm756_vm4, %v2177_v56, 0.0  ;;  %v2181_v60 = vpop.f32.mrb[6].mxu1 }
 0x20c   : > { %v1198_v63 = vadd.f32 %v1197_v22, %v1196_v18  ;;  %v1114_v8 = vpop.f32.mrb[7].mxu1  ;;  %v1203_v53 = vsel %vm756_vm4, %v2181_v60, 0.0 }
 0x20d   : > { %v1199_v26 = vsel %vm756_vm4, %v1114_v8, 0.0 }
 0x20e   : > { %v1200_v10 = vadd.f32 %v1199_v26, %v1198_v63 }
 0x210   : > { %v1202_v6 = vadd.f32 %v1201_v28, %v1200_v10 }
 0x211   : > { %v1550_v19 = vpop.f32.mrb[8].mxu1 }
 0x212   : > { %v1127_v37 = vpop.f32.mrb[9].mxu1  ;;  %v1204_v15 = vadd.f32 %v1203_v53, %v1202_v6  ;;  %v1209_v44 = vsel %vm756_vm4, %v1550_v19, 0.0 }
 0x213   : > { %v1205_v38 = vsel %vm756_vm4, %v1127_v37, 0.0  ;;  %v1551_v40 = vpop.f32.mrb[10].mxu1 }
 0x214   : > { %v1206_v21 = vadd.f32 %v1205_v38, %v1204_v15  ;;  %v1130_v52 = vpop.f32.mrb[11].mxu1  ;;  %v1211_v47 = vsel %vm756_vm4, %v1551_v40, 0.0 }
 0x215   : > { %v1207_v41 = vsel %vm756_vm4, %v1130_v52, 0.0 }
 0x216   : > { %v1208_v7 = vadd.f32 %v1207_v41, %v1206_v21 }
 0x218   : > { %v1210_v27 = vadd.f32 %v1209_v44, %v1208_v7 }
 0x219   : > { %v1554_v49 = vpop.f32.mrb[12].mxu1 }
 0x21a   : > { %v1143_v32 = vpop.f32.mrb[13].mxu1  ;;  %v1212_v30 = vadd.f32 %v1211_v47, %v1210_v27  ;;  %v1217_v42 = vsel %vm756_vm4, %v1554_v49, 0.0 }
 0x21b   : > { %v1213_v50 = vsel %vm756_vm4, %v1143_v32, 0.0  ;;  %v1555_v36 = vpop.f32.mrb[14].mxu1 }
 0x21c   : > { %v1214_v55 = vadd.f32 %v1213_v50, %v1212_v30  ;;  %v1146_v39 = vpop.f32.mrb[15].mxu1  ;;  %v1219_v3 = vsel %vm756_vm4, %v1555_v36, 0.0 }
 0x21d   : > { %v1215_v62 = vsel %vm756_vm4, %v1146_v39, 0.0 }
 0x21e   : > { %v1216_v1 = vadd.f32 %v1215_v62, %v1214_v55 }
 0x220   : > { %v1218_v59 = vadd.f32 %v1217_v42, %v1216_v1 }
 0x222   : > { %v1220_v20 = vadd.f32 %v1219_v3, %v1218_v59 }
 0x224   : > { %v1221_v9 = vrot.slane %v1220_v20, 4 }
 0x226   : > { %v1222_v48 = vadd.f32 %v1221_v9, %v1220_v20 }
 0x228   : > { %v1223_v12 = vrot.slane %v1222_v48, 2 }
 0x22a   : > { %v1224_v14 = vadd.f32 %v1223_v12, %v1222_v48 }
 0x22c   : > { %v1225_v51 = vrot.slane %v1224_v14, 1 }
 0x22e   : > { %v1226_v57 = vadd.f32 %v1225_v51, %v1224_v14 }
 0x230   : > { %v1227_v16 = vmul.f32 0.00390625, %v1226_v57  ;;  %1362 = vst.msk [vmem:[%s172_s30] sm:$0x1] %vm1361_vm8, %v1226_v57 }
 0x232   : > { %v1228_v18 = vsub.f32 %v2097_v23, %v1227_v16  ;;  %v1229_v22 = vsub.f32 %v2101_v4, %v1227_v16  ;;  %v1230_v63 = vsub.f32 %v2095_v2, %v1227_v16  ;;  %v1231_v26 = vsub.f32 %v2099_v0, %v1227_v16 }
 0x233   : > { %v1232_v10 = vsub.f32 %v2113_v35, %v1227_v16  ;;  %v1233_v28 = vsub.f32 %v2119_v34, %v1227_v16  ;;  %v1234_v6 = vsub.f32 %v2111_v29, %v1227_v16  ;;  %v1235_v53 = vsub.f32 %v2117_v33, %v1227_v16 }
 0x234   : > { %v1236_v15 = vsub.f32 %v2129_v24, %v1227_v16  ;;  %v1237_v38 = vsub.f32 %v2135_v13, %v1227_v16  ;;  %v1238_v23 = vsub.f32 %v2127_v43, %v1227_v16  ;;  %v1239_v4 = vsub.f32 %v2133_v46, %v1227_v16 }
 0x235   : > { %v1240_v2 = vsub.f32 %v2145_v31, %v1227_v16  ;;  %v1241_v0 = vsub.f32 %v2151_v58, %v1227_v16  ;;  %v1242_v35 = vsub.f32 %v2143_v54, %v1227_v16  ;;  %v1243_v34 = vsub.f32 %v2149_v61, %v1227_v16 }
 0x236   : > { %v1244_v29 = vsub.f32 %v2161_v45, %v1227_v16  ;;  %v1245_v33 = vsub.f32 %v2167_v11, %v1227_v16  ;;  %v2220_v24 = vsub.f32 %v2159_v5, %v1227_v16  ;;  %v2223_v13 = vsub.f32 %v2165_v25, %v1227_v16 }
 0x237   : > { %v2226_v43 = vsub.f32 %v2177_v56, %v1227_v16  ;;  %v2228_v46 = vsub.f32 %v1114_v8, %v1227_v16  ;;  %v2231_v31 = vsub.f32 %v2175_v17, %v1227_v16  ;;  %v2234_v54 = vsub.f32 %v2181_v60, %v1227_v16 }
 0x238   : > { %v2236_v61 = vsub.f32 %v1127_v37, %v1227_v16  ;;  %v2238_v58 = vsub.f32 %v1130_v52, %v1227_v16  ;;  %v2240_v5 = vsub.f32 %v1550_v19, %v1227_v16  ;;  %v2242_v45 = vsub.f32 %v1551_v40, %v1227_v16 }
 0x239   : > { %v2244_v25 = vsub.f32 %v1143_v32, %v1227_v16  ;;  %v2246_v11 = vsub.f32 %v1146_v39, %v1227_v16  ;;  %v2248_v56 = vsub.f32 %v1554_v49, %v1227_v16  ;;  %v2250_v8 = vsub.f32 %v1555_v36, %v1227_v16 }
 0x23a   : > { %v1260_v17 = vmul.f32 %v1228_v18, %v1228_v18  ;;  %v1261_v21 = vmul.f32 %v1229_v22, %v1229_v22  ;;  %v1262_v60 = vmul.f32 %v1230_v63, %v1230_v63  ;;  %v1263_v41 = vmul.f32 %v1231_v26, %v1231_v26 }
 0x23b   : > { %v1264_v7 = vmul.f32 %v1232_v10, %v1232_v10  ;;  %v1265_v27 = vmul.f32 %v1233_v28, %v1233_v28  ;;  %v1266_v32 = vmul.f32 %v1234_v6, %v1234_v6  ;;  %v1267_v36 = vmul.f32 %v1235_v53, %v1235_v53 }
 0x23c   : > { %v1292_v37 = vsel %vm756_vm4, %v1260_v17, 0.0  ;;  %v1293_v52 = vsel %vm756_vm4, %v1261_v21, 0.0  ;;  %v1295_v40 = vsel %vm756_vm4, %v1262_v60, 0.0  ;;  %v1297_v47 = vsel %vm756_vm4, %v1263_v41, 0.0 }
 0x23d   : > { %v1294_v19 = vadd.f32 %v1293_v52, %v1292_v37  ;;  %v1299_v30 = vsel %vm756_vm4, %v1264_v7, 0.0  ;;  %v1301_v55 = vsel %vm756_vm4, %v1265_v27, 0.0  ;;  %v1268_v62 = vmul.f32 %v1236_v15, %v1236_v15 }
 0x23e   : > { %v1303_v1 = vsel %vm756_vm4, %v1266_v32, 0.0  ;;  %v1269_v59 = vmul.f32 %v1237_v38, %v1237_v38  ;;  %v1305_v3 = vsel %vm756_vm4, %v1267_v36, 0.0  ;;  %v1270_v9 = vmul.f32 %v1238_v23, %v1238_v23 }
 0x23f   : > { %v1296_v44 = vadd.f32 %v1295_v40, %v1294_v19  ;;  %v1307_v48 = vsel %vm756_vm4, %v1268_v62, 0.0  ;;  %v1271_v14 = vmul.f32 %v1239_v4, %v1239_v4  ;;  %v1272_v16 = vmul.f32 %v1240_v2, %v1240_v2 }
 0x240   : > { %v1309_v51 = vsel %vm756_vm4, %v1269_v59, 0.0  ;;  %v1311_v18 = vsel %vm756_vm4, %v1270_v9, 0.0  ;;  %v1273_v63 = vmul.f32 %v1241_v0, %v1241_v0  ;;  %v1274_v28 = vmul.f32 %v1242_v35, %v1242_v35 }
 0x241   : > { %v1298_v49 = vadd.f32 %v1297_v47, %v1296_v44  ;;  %v1313_v26 = vsel %vm756_vm4, %v1271_v14, 0.0  ;;  %v1315_v6 = vsel %vm756_vm4, %v1272_v16, 0.0  ;;  %v1275_v15 = vmul.f32 %v1243_v34, %v1243_v34 }
 0x242   : > { %v1317_v38 = vsel %vm756_vm4, %v1273_v63, 0.0  ;;  %v1276_v4 = vmul.f32 %v1244_v29, %v1244_v29  ;;  %v1319_v17 = vsel %vm756_vm4, %v1274_v28, 0.0  ;;  %v1277_v2 = vmul.f32 %v1245_v33, %v1245_v33 }
 0x243   : > { %v1300_v50 = vadd.f32 %v1299_v30, %v1298_v49  ;;  %v1321_v60 = vsel %vm756_vm4, %v1275_v15, 0.0  ;;  %v1278_v0 = vmul.f32 %v2220_v24, %v2220_v24  ;;  %v1279_v34 = vmul.f32 %v2223_v13, %v2223_v13 }
 0x244   : > { %v1323_v35 = vsel %vm756_vm4, %v1276_v4, 0.0  ;;  %v1325_v52 = vsel %vm756_vm4, %v1277_v2, 0.0  ;;  %v1280_v29 = vmul.f32 %v2226_v43, %v2226_v43  ;;  %v1281_v40 = vmul.f32 %v2228_v46, %v2228_v46 }
 0x245   : > { %v1302_v39 = vadd.f32 %v1301_v55, %v1300_v50  ;;  %v1327_v33 = vsel %vm756_vm4, %v1278_v0, 0.0  ;;  %v1329_v24 = vsel %vm756_vm4, %v1279_v34, 0.0  ;;  %v1282_v27 = vmul.f32 %v2231_v31, %v2231_v31 }
 0x246   : > { %v1331_v13 = vsel %vm756_vm4, %v1280_v29, 0.0  ;;  %v1283_v49 = vmul.f32 %v2234_v54, %v2234_v54  ;;  %v1333_v43 = vsel %vm756_vm4, %v1281_v40, 0.0  ;;  %v1284_v30 = vmul.f32 %v2236_v61, %v2236_v61 }
 0x247   : > { %v1304_v42 = vadd.f32 %v1303_v1, %v1302_v39  ;;  %v1335_v46 = vsel %vm756_vm4, %v1282_v27, 0.0  ;;  %v1285_v36 = vmul.f32 %v2238_v58, %v2238_v58  ;;  %v1286_v39 = vmul.f32 %v2240_v5, %v2240_v5 }
 0x248   : > { %v1337_v31 = vsel %vm756_vm4, %v1283_v49, 0.0  ;;  %v1339_v54 = vsel %vm756_vm4, %v1284_v30, 0.0  ;;  %v1287_v1 = vmul.f32 %v2242_v45, %v2242_v45  ;;  %v1288_v59 = vmul.f32 %v2244_v25, %v2244_v25 }
 0x249   : > { %v1306_v20 = vadd.f32 %v1305_v3, %v1304_v42  ;;  %v1341_v61 = vsel %vm756_vm4, %v1285_v36, 0.0  ;;  %v1343_v58 = vsel %vm756_vm4, %v1286_v39, 0.0  ;;  %v1291_v14 = vmul.f32 %v2250_v8, %v2250_v8 }
 0x24a   : > { %v1345_v5 = vsel %vm756_vm4, %v1287_v1, 0.0  ;;  %v1347_v45 = vsel %vm756_vm4, %v1288_v59, 0.0 }
 0x24b   : > { %v1308_v12 = vadd.f32 %v1307_v48, %v1306_v20  ;;  %v1289_v20 = vmul.f32 %v2246_v11, %v2246_v11  ;;  %v1290_v48 = vmul.f32 %v2248_v56, %v2248_v56  ;;  %v1353_v11 = vsel %vm756_vm4, %v1291_v14, 0.0 }
 0x24d   : > { %v1310_v57 = vadd.f32 %v1309_v51, %v1308_v12  ;;  %v1349_v25 = vsel %vm756_vm4, %v1289_v20, 0.0 }
 0x24f   : > { %v1312_v22 = vadd.f32 %v1311_v18, %v1310_v57  ;;  %v1351_v57 = vsel %vm756_vm4, %v1290_v48, 0.0 }
 0x251   : > { %v1314_v10 = vadd.f32 %v1313_v26, %v1312_v22 }
 0x253   : > { %v1316_v53 = vadd.f32 %v1315_v6, %v1314_v10 }
 0x255   : > { %v1318_v23 = vadd.f32 %v1317_v38, %v1316_v53 }
 0x257   : > { %v1320_v21 = vadd.f32 %v1319_v17, %v1318_v23 }
 0x259   : > { %v1322_v41 = vadd.f32 %v1321_v60, %v1320_v21 }
 0x25b   : > { %v1324_v37 = vadd.f32 %v1323_v35, %v1322_v41 }
 0x25d   : > { %v1326_v19 = vadd.f32 %v1325_v52, %v1324_v37 }
 0x25f   : > { %v1328_v7 = vadd.f32 %v1327_v33, %v1326_v19 }
 0x261   : > { %v1330_v44 = vadd.f32 %v1329_v24, %v1328_v7 }
 0x263   : > { %v1332_v47 = vadd.f32 %v1331_v13, %v1330_v44 }
 0x265   : > { %v1334_v32 = vadd.f32 %v1333_v43, %v1332_v47 }
 0x267   : > { %v1336_v50 = vadd.f32 %v1335_v46, %v1334_v32 }
 0x269   : > { %v1338_v55 = vadd.f32 %v1337_v31, %v1336_v50 }
 0x26b   : > { %v1340_v62 = vadd.f32 %v1339_v54, %v1338_v55 }
 0x26d   : > { %v1342_v42 = vadd.f32 %v1341_v61, %v1340_v62 }
 0x26f   : > { %v1344_v3 = vadd.f32 %v1343_v58, %v1342_v42 }
 0x271   : > { %v1346_v9 = vadd.f32 %v1345_v5, %v1344_v3 }
 0x273   : > { %v1348_v12 = vadd.f32 %v1347_v45, %v1346_v9 }
 0x275   : > { %v1350_v51 = vadd.f32 %v1349_v25, %v1348_v12 }
 0x277   : > { %v1352_v16 = vadd.f32 %v1351_v57, %v1350_v51 }
 0x279   : > { %v1354_v18 = vadd.f32 %v1353_v11, %v1352_v16 }
 0x27b   : > { %v1355_v22 = vrot.slane %v1354_v18, 4 }
 0x27d   : > { %v1356_v63 = vadd.f32 %v1355_v22, %v1354_v18 }
 0x27f   : > { %v1357_v26 = vrot.slane %v1356_v63, 2 }
 0x281   : > { %v1358_v10 = vadd.f32 %v1357_v26, %v1356_v63 }
 0x283   : > { %v1359_v56 = vrot.slane %v1358_v10, 1 }
 0x285   : > { %v1360_v28 = vadd.f32 %v1359_v56, %v1358_v10 }
 0x287   : > { %1363 = vst.msk [vmem:[%s175_s6] sm:$0x1] %vm1361_vm8, %v1360_v28 }
 0x288 PF: > { %s14_s12 = sadd.s32 1, %s1622_s12  }
 0x289   : > { %p11_p4 = scmp.ge.s32.totalorder %s14_s12, 4  }
 0x28b   :  { %13 = sbr.rel (!%p11_p4) target bundleno = 1 (0x1), region = 70 }

// kernel: conv_dropout_norm_nonlin.3
= control target key start
LH: loop header
LB: loop body
LE: loop exit
PB: predicated region body
PF: predicated region fallthrough
CT: control target
= control target key end

     0   :  { %s1697_s15 = smov 0   ;;  %s2232_s0 = inlined_call_operand.vmem [shape: bf16[2,18,18,4], index: 0, kind: input, shape index: {}]   ;;  %s2233_s1 = inlined_call_operand.vmem [shape: bf16[36,8], index: 1, kind: input, shape index: {}]   ;;  %s2234_s2 = inlined_call_operand.vmem [shape: f32[1,8], index: 2, kind: input, shape index: {}]   ;;  %s2235_s3 = inlined_call_operand.vmem [shape: f32[1,8], index: 3, kind: input, shape index: {}]   ;;  %s2236_s4 = inlined_call_operand.vmem [shape: f32[2,8,256], index: 4, kind: output, shape index: {}]  }
   0x1 LB: > { %s1475_s16 = sadd.s32 4294967295, %s1666_s15   ;;  %p1479_p0 = scmp.ge.s32.totalorder %s1666_s15, 1  ;;  %s1666_s15 = sphi %s1697_s15, %s14_s15  }
   0x2   : > { %p162_p1 = scmp.lt.s32.totalorder %s1666_s15, 3 }
   0x4   : > { %p163_p2 = pnand %p1479_p0, %p162_p1 }
   0x5   : > { %p188_p3 = scmp.lt.s32.totalorder (!%p163_p2), %s1475_s16, 1  ;;  %vm650_vm0 = vcmask (!%p163_p2), 1046528   ;;  %vm397_vm1 = vsmask.f32 (!%p163_p2), 7424  ;;  %s1668_s21 = smov (!%p163_p2), 8   ;;  %vm741_vm2 = vcmask (!%p163_p2), 31744  }
   0x6   : > { %166 = sbr.rel (%p163_p2) target bundleno = 629 (0x275), region = 36  ;;  %s1669_s22 = smov (!%p163_p2), 4   ;;  %vm1015_vm3 = vcmask (!%p163_p2), 1041408   ;;  %vm778_vm4 = vcmask (!%p163_p2), 64512   ;;  %vm896_vm5 = vcmask (!%p163_p2), 97280   ;;  %vm929_vm6 = vcmask (!%p163_p2), 195584  }
   0x7   : > { %s1670_s29 = smov (!%p163_p2), 12   ;;  %s1671_s30 = smov (!%p163_p2), 24   ;;  %vm982_vm7 = vcmask (!%p163_p2), 293888  }
   0xd   : > { %s2238_s16 = smov (!%p188_p3, %s1475_s16), 1 }
   0xe   : > { %s1608_s17 = smul.u32 216, %s2238_s16  ;;  %s1542_s9 = sshll.u32 %s2238_s16, 4 }
   0xf   : > { %s197_s12 = scalar_lea.vmem %s2236_s4, %s1542_s9 }
  0x10   : > { %s1711_s20 = scalar_lea.vmem %s2232_s0, %s1608_s17 }
  0x11   : > { %v1714_v0 = vld [vmem:[%s1711_s20 + $0x6c] sm:$0xff]   ;;  %v1622_v1 = vld [vmem:[%s1711_s20 + $0x74] ss:$0 sps:$4 sm:$0x11]   ;;  %v1723_v6 = vld [vmem:[%s1711_s20 + $0x78] sm:$0xff]  }
  0x12   : > { %v1718_v2 = vld [vmem:[%s1711_s20 + $0xc] sm:$0xff]   ;;  %v678_v3 = vrot.slane %v1714_v0, 1  ;;  %v679_v4 = vrot.slane %v1622_v1, 1  ;;  %v1624_v5 = vld [vmem:[%s1711_s20 + $0x14] ss:$0 sps:$4 sm:$0x11]  }
  0x13   : > { %v654_v7 = vrot.slane %v1718_v2, 1  ;;  %v1727_v8 = vld [vmem:[%s1711_s20 + $0x18] sm:$0xff]   ;;  %v655_v10 = vrot.slane %v1624_v5, 1  ;;  %v1626_v11 = vld [vmem:[%s1711_s20 + $0x80] ss:$0 sps:$4 sm:$0x11]  }
  0x14   : > { %v680_v9 = vsel %vm650_vm0, %v678_v3, %v679_v4  ;;  %v681_v12 = vrot.slane %v1723_v6, 1  ;;  %v657_v13 = vrot.slane %v1727_v8, 1  ;;  %v682_v15 = vrot.slane %v1626_v11, 1  ;;  %v1628_v16 = vld [vmem:[%s1711_s20 + $0x20] ss:$0 sps:$4 sm:$0x11]  }
  0x15   : > { %723 = vrot.lane.b32.xlu1 %v680_v9, %s1668_s21  ;;  %v656_v14 = vsel %vm650_vm0, %v654_v7, %v655_v10  ;;  %v423_v17 = vshrl.u32 %v1727_v8, 16  ;;  %v425_v18 = vshll.u32 %v1727_v8, 16  ;;  %v411_v19 = vshrl.u32 %v1718_v2, 16  ;;  %v1743_v25 = vld [vmem:[%s1711_s20 + $0x84] sm:$0xff]   ;;  %v1762_v49 = vld [vmem:[%s1711_s20 + $0x90] sm:$0xff]   ;;  %v1774_v63 = vld [vmem:[%s1711_s20 + $0x9c] sm:$0xff]  }
  0x16   : > { %707 = vrot.lane.b32.xlu0 %v656_v14, %s1668_s21  ;;  %v413_v20 = vshll.u32 %v1718_v2, 16  ;;  %v683_v21 = vsel %vm650_vm0, %v681_v12, %v682_v15  ;;  %v658_v22 = vrot.slane %v1628_v16, 1  ;;  %v430_v23 = vshll.u32 %v1628_v16, 16  ;;  %v1630_v34 = vld [vmem:[%s1711_s20 + $0x8c] ss:$0 sps:$4 sm:$0x11]  }
  0x17   : > { %v418_v24 = vshll.u32 %v1624_v5, 16  ;;  %v427_v26 = vrot.slane %v425_v18, 1  ;;  %v519_v28 = vshrl.u32 %v1723_v6, 16  ;;  %v521_v29 = vshll.u32 %v1723_v6, 16  ;;  %v1758_v47 = vld [vmem:[%s1711_s20 + $0x24] sm:$0xff]   ;;  %v1771_v58 = vld [vmem:[%s1711_s20 + $0x30] sm:$0xff]  }
  0x18   : > { %v415_v27 = vrot.slane %v413_v20, 1  ;;  %v659_v30 = vsel %vm650_vm0, %v657_v13, %v658_v22  ;;  %v432_v31 = vrot.slane %v430_v23, 1  ;;  %v526_v33 = vshll.u32 %v1626_v11, 16  ;;  %v1632_v48 = vld [vmem:[%s1711_s20 + $0x2c] ss:$0 sps:$4 sm:$0x11]  }
  0x19   : > { %725 = vrot.lane.b32.xlu1 %v683_v21, %s1668_s21  ;;  %v420_v32 = vrot.slane %v418_v24, 1  ;;  %v428_v35 = vor.u32 %v427_v26, %v423_v17  ;;  %v523_v37 = vrot.slane %v521_v29, 1  ;;  %v507_v38 = vshrl.u32 %v1714_v0, 16  ;;  %v1778_v7 = vld [vmem:[%s1711_s20 + $0x98] ss:$0 sps:$4 sm:$0x11]  }
  0x1a   : > { %709 = vrot.lane.b32.xlu0 %v659_v30, %s1668_s21  ;;  %v416_v36 = vor.u32 %v415_v27, %v411_v19  ;;  %v528_v39 = vrot.slane %v526_v33, 1  ;;  %v509_v40 = vshll.u32 %v1714_v0, 16  ;;  %v514_v41 = vshll.u32 %v1622_v1, 16  ;;  %v1787_v15 = vld [vmem:[%s1711_s20 + $0x38] ss:$0 sps:$4 sm:$0x11]  }
  0x1b   : > { %v531_v42 = vshrl.u32 %v1743_v25, 16  ;;  %v433_v43 = vsel %vm397_vm1, %v428_v35, %v432_v31  ;;  %v524_v45 = vor.u32 %v523_v37, %v519_v28  ;;  %v533_v46 = vshll.u32 %v1743_v25, 16  ;;  %v1638_v24 = vld [vmem:[%s1711_s20 + $0xa4] ss:$0 sps:$4 sm:$0x11]   ;;  %v1802_v31 = vld [vmem:[%s1711_s20 + $0x3c] sm:$0xff]  }
  0x1c   : > { %v421_v44 = vsel %vm397_vm1, %v416_v36, %v420_v32  ;;  %v511_v50 = vrot.slane %v509_v40, 1  ;;  %v516_v51 = vrot.slane %v514_v41, 1  ;;  %v538_v52 = vshll.u32 %v1630_v34, 16  ;;  %v1640_v36 = vld [vmem:[%s1711_s20 + $0x44] ss:$0 sps:$4 sm:$0x11]  }
  0x1d   : > { %618 = vrot.lane.b32.xlu1 %v433_v43, %s1669_s22  ;;  %v684_v53 = vrot.slane %v1743_v25, 1  ;;  %v529_v54 = vsel %vm397_vm1, %v524_v45, %v528_v39  ;;  %v535_v55 = vrot.slane %v533_v46, 1  ;;  %v435_v56 = vshrl.u32 %v1758_v47, 16  ;;  %v1815_v46 = vld [vmem:[%s1711_s20 + $0xb0] ss:$0 sps:$4 sm:$0x11]  }
  0x1e   : > { %616 = vrot.lane.b32.xlu0 %v421_v44, %s1669_s22  ;;  %v437_v57 = vshll.u32 %v1758_v47, 16  ;;  %v512_v59 = vor.u32 %v511_v50, %v507_v38  ;;  %v540_v60 = vrot.slane %v538_v52, 1  ;;  %v442_v61 = vshll.u32 %v1632_v48, 16  ;;  %v1811_v44 = vld [vmem:[%s1711_s20 + $0xa8] sm:$0xff]  }
  0x1f   : > { %v685_v62 = vrot.slane %v1630_v34, 1  ;;  %v536_v1 = vor.u32 %v535_v55, %v531_v42  ;;  %v660_v4 = vrot.slane %v1758_v47, 1  ;;  %v661_v5 = vrot.slane %v1632_v48, 1  ;;  %v1818_v48 = vld [vmem:[%s1711_s20 + $0x48] sm:$0xff]  }
  0x20   : > { %v439_v3 = vrot.slane %v437_v57, 1  ;;  %v517_v9 = vsel %vm397_vm1, %v512_v59, %v516_v51  ;;  %v444_v10 = vrot.slane %v442_v61, 1  ;;  %v543_v11 = vshrl.u32 %v1762_v49, 16  ;;  %v1830_v61 = vld [vmem:[%s1711_s20 + $0x50] ss:$0 sps:$4 sm:$0x11]  }
  0x21   : > { %634 = vrot.lane.b32.xlu1 %v529_v54, %s1669_s22  ;;  %v541_v12 = vsel %vm397_vm1, %v536_v1, %v540_v60  ;;  %v545_v14 = vshll.u32 %v1762_v49, 16  ;;  %v550_v16 = vshll.u32 %v1778_v7, 16  ;;  %v447_v17 = vshrl.u32 %v1771_v58, 16 }
  0x22   : > { %632 = vrot.lane.b32.xlu0 %v517_v9, %s1669_s22  ;;  %v440_v13 = vor.u32 %v439_v3, %v435_v56  ;;  %v449_v18 = vshll.u32 %v1771_v58, 16  ;;  %v454_v21 = vshll.u32 %v1787_v15, 16  ;;  %v557_v26 = vshll.u32 %v1774_v63, 16 }
  0x23   : > { %v547_v20 = vrot.slane %v545_v14, 1  ;;  %v552_v22 = vrot.slane %v550_v16, 1  ;;  %v686_v27 = vsel %vm650_vm0, %v684_v53, %v685_v62  ;;  %v662_v28 = vsel %vm650_vm0, %v660_v4, %v661_v5  ;;  %v1833_v62 = vld [vmem:[%s1711_s20 + $0xb4] sm:$0xff]  }
  0x24   : > { %v445_v19 = vsel %vm397_vm1, %v440_v13, %v444_v10  ;;  %v451_v23 = vrot.slane %v449_v18, 1  ;;  %v555_v30 = vshrl.u32 %v1774_v63, 16  ;;  %v456_v33 = vrot.slane %v454_v21, 1  ;;  %v1838_v4 = vld [vmem:[%s1711_s20 + $0x54] sm:$0xff]  }
  0x25   : > { %636 = vrot.lane.b32.xlu1 %v541_v12, %s1669_s22  ;;  %v548_v29 = vor.u32 %v547_v20, %v543_v11  ;;  %v559_v34 = vrot.slane %v557_v26, 1  ;;  %v562_v35 = vshll.u32 %v1638_v24, 16  ;;  %v459_v37 = vshrl.u32 %v1802_v31, 16  ;;  %v1846_v12 = vld [vmem:[%s1711_s20 + $0xbc] ss:$0 sps:$4 sm:$0x11]  }
  0x26   : > { %620 = vrot.lane.b32.xlu0 %v445_v19, %s1669_s22  ;;  %v452_v32 = vor.u32 %v451_v23, %v447_v17  ;;  %v461_v38 = vshll.u32 %v1802_v31, 16  ;;  %v466_v43 = vshll.u32 %v1640_v36, 16  ;;  %v687_v52 = vrot.slane %v1762_v49, 1  ;;  %v1854_v19 = vld [vmem:[%s1711_s20 + $0x5c] ss:$0 sps:$4 sm:$0x11]  }
  0x27   : > { %v553_v39 = vsel %vm397_vm1, %v548_v29, %v552_v22  ;;  %v560_v40 = vor.u32 %v559_v34, %v555_v30  ;;  %v564_v41 = vrot.slane %v562_v35, 1  ;;  %v688_v53 = vrot.slane %v1778_v7, 1 }
  0x28   : > { %v463_v42 = vrot.slane %v461_v38, 1  ;;  %v457_v45 = vsel %vm397_vm1, %v452_v32, %v456_v33  ;;  %v468_v51 = vrot.slane %v466_v43, 1  ;;  %v663_v54 = vrot.slane %v1771_v58, 1  ;;  %v1869_v38 = vld [vmem:[%s1711_s20 + $0xc0] sm:$0xff]  }
  0x29   : > { %727 = vrot.lane.b32.xlu1 %v686_v27, %s1668_s21  ;;  %v664_v55 = vrot.slane %v1787_v15, 1  ;;  %v690_v56 = vrot.slane %v1774_v63, 1  ;;  %v565_v57 = vsel %vm397_vm1, %v560_v40, %v564_v41  ;;  %v691_v59 = vrot.slane %v1638_v24, 1 }
  0x2a   : > { %711 = vrot.lane.b32.xlu0 %v662_v28, %s1668_s21  ;;  %v464_v50 = vor.u32 %v463_v42, %v459_v37  ;;  %v569_v60 = vshll.u32 %v1811_v44, 16  ;;  %v473_v3 = vshll.u32 %v1818_v48, 16  ;;  %v666_v5 = vrot.slane %v1802_v31, 1  ;;  %v1873_v42 = vld [vmem:[%s1711_s20 + $0x60] sm:$0xff]  }
  0x2b   : > { %v667_v7 = vrot.slane %v1640_v36, 1  ;;  %v567_v9 = vshrl.u32 %v1811_v44, 16  ;;  %v574_v10 = vshll.u32 %v1815_v46, 16  ;;  %v471_v11 = vshrl.u32 %v1818_v48, 16 }
  0x2c   : > { %v469_v1 = vsel %vm397_vm1, %v464_v50, %v468_v51  ;;  %v689_v13 = vsel %vm650_vm0, %v687_v52, %v688_v53  ;;  %v571_v14 = vrot.slane %v569_v60, 1  ;;  %v581_v15 = vshll.u32 %v1833_v62, 16  ;;  %v1880_v51 = vld [vmem:[%s1711_s20 + $0xc8] ss:$0 sps:$4 sm:$0x11]  }
  0x2d   : > { %638 = vrot.lane.b32.xlu1 %v553_v39, %s1669_s22  ;;  %v665_v16 = vsel %vm650_vm0, %v663_v54, %v664_v55  ;;  %v475_v17 = vrot.slane %v473_v3, 1  ;;  %v478_v18 = vshll.u32 %v1830_v61, 16  ;;  %v485_v20 = vshll.u32 %v1838_v4, 16 }
  0x2e   : > { %622 = vrot.lane.b32.xlu0 %v457_v45, %s1669_s22  ;;  %v692_v21 = vsel %vm650_vm0, %v690_v56, %v691_v59  ;;  %v668_v22 = vsel %vm650_vm0, %v666_v5, %v667_v7  ;;  %v576_v23 = vrot.slane %v574_v10, 1  ;;  %v579_v24 = vshrl.u32 %v1833_v62, 16  ;;  %v1652_v56 = vld [vmem:[%s1711_s20 + $0x68] ss:$0 sps:$4 sm:$0x11]   ;;  %v1893_v59 = vld [vmem:[%s1711_s20] sm:$0xff]  }
  0x2f   : > { %v572_v26 = vor.u32 %v571_v14, %v567_v9  ;;  %v583_v27 = vrot.slane %v581_v15, 1  ;;  %v586_v28 = vshll.u32 %v1846_v12, 16  ;;  %v483_v29 = vshrl.u32 %v1838_v4, 16  ;;  %v1656_v5 = vld [vmem:[%s1711_s20 + $0x8] ss:$0 sps:$4 sm:$0x11]  }
  0x30   : > { %v476_v30 = vor.u32 %v475_v17, %v471_v11  ;;  %v480_v32 = vrot.slane %v478_v18, 1  ;;  %v487_v33 = vrot.slane %v485_v20, 1  ;;  %v490_v34 = vshll.u32 %v1854_v19, 16  ;;  %v1654_v18 = vld [vmem:[%s1711_s20 + $0xd4] ss:$0 sps:$4 sm:$0x11]  }
  0x31   : > { %640 = vrot.lane.b32.xlu1 %v565_v57, %s1669_s22  ;;  %v577_v35 = vsel %vm397_vm1, %v572_v26, %v576_v23  ;;  %v584_v36 = vor.u32 %v583_v27, %v579_v24  ;;  %v588_v37 = vrot.slane %v586_v28, 1  ;;  %v693_v43 = vrot.slane %v1811_v44, 1  ;;  %v1890_v57 = vld [vmem:[%s1711_s20 + $0xcc] sm:$0xff]  }
  0x32   : > { %624 = vrot.lane.b32.xlu0 %v469_v1, %s1669_s22  ;;  %v481_v39 = vsel %vm397_vm1, %v476_v30, %v480_v32  ;;  %v488_v40 = vor.u32 %v487_v33, %v483_v29  ;;  %v492_v41 = vrot.slane %v490_v34, 1  ;;  %v694_v45 = vrot.slane %v1815_v46, 1 }
  0x33   : > { %v669_v50 = vrot.slane %v1818_v48, 1  ;;  %v589_v52 = vsel %vm397_vm1, %v584_v36, %v588_v37  ;;  %v670_v53 = vrot.slane %v1830_v61, 1  ;;  %v593_v54 = vshll.u32 %v1869_v38, 16 }
  0x34   : > { %v493_v55 = vsel %vm397_vm1, %v488_v40, %v492_v41  ;;  %v497_v46 = vshll.u32 %v1873_v42, 16  ;;  %v695_v60 = vsel %vm650_vm0, %v693_v43, %v694_v45  ;;  %v696_v1 = vrot.slane %v1833_v62, 1 }
  0x35   : > { %729 = vrot.lane.b32.xlu1 %v689_v13, %s1668_s21  ;;  %v697_v3 = vrot.slane %v1846_v12, 1  ;;  %v672_v61 = vrot.slane %v1838_v4, 1  ;;  %v673_v7 = vrot.slane %v1854_v19, 1  ;;  %v591_v9 = vshrl.u32 %v1869_v38, 16 }
  0x36   : > { %713 = vrot.lane.b32.xlu0 %v665_v16, %s1668_s21  ;;  %v651_v10 = vrot.slane %v1893_v59, 1  ;;  %v595_v11 = vrot.slane %v593_v54, 1  ;;  %v598_v13 = vshll.u32 %v1880_v51, 16  ;;  %v495_v14 = vshrl.u32 %v1873_v42, 16 }
  0x37   : > { %v652_v15 = vrot.slane %v1656_v5, 1  ;;  %v671_v12 = vsel %vm650_vm0, %v669_v50, %v670_v53  ;;  %v499_v16 = vrot.slane %v497_v46, 1  ;;  %v502_v17 = vshll.u32 %v1652_v56, 16 }
  0x38   : > { %v605_v20 = vshll.u32 %v1890_v57, 16  ;;  %v596_v23 = vor.u32 %v595_v11, %v591_v9  ;;  %v600_v24 = vrot.slane %v598_v13, 1  ;;  %v603_v26 = vshrl.u32 %v1890_v57, 16  ;;  %v1659_v11 = vld [vmem:[%s2233_s1 + $0x10] ss:$0 sps:$4 sm:$0x33]  }
  0x39   : > { %731 = vrot.lane.b32.xlu1 %v692_v21, %s1668_s21  ;;  %v653_v19 = vsel %vm650_vm0, %v651_v10, %v652_v15  ;;  %v698_v21 = vsel %vm650_vm0, %v696_v1, %v697_v3  ;;  %v500_v27 = vor.u32 %v499_v16, %v495_v14  ;;  %v504_v28 = vrot.slane %v502_v17, 1  ;;  %v1657_v3 = vld [vmem:[%s2233_s1] sm:$0xff]  }
  0x3a   : > { %715 = vrot.lane.b32.xlu0 %v668_v22, %s1668_s21  ;;  %v674_v22 = vsel %vm650_vm0, %v672_v61, %v673_v7  ;;  %v607_v29 = vrot.slane %v605_v20, 1  ;;  %v610_v30 = vshll.u32 %v1654_v18, 16  ;;  %v675_v32 = vrot.slane %v1873_v42, 1  ;;  %1562 = vmatprep.subr.bf16.mxu0 %v1657_v3  ;;  %v1658_v7 = vld [vmem:[%s2233_s1 + $0x8] sm:$0xff]  }
  0x3b   : > { %v676_v33 = vrot.slane %v1652_v56, 1  ;;  %v601_v34 = vsel %vm397_vm1, %v596_v23, %v600_v24  ;;  %v702_v41 = vrot.slane %v1890_v57, 1  ;;  %v703_v43 = vrot.slane %v1654_v18, 1  ;;  %1600 = vmatprep.subr.bf16.mxu1 %v1657_v3  ;;  %1563 = vmatpush3.bf16.msra.mxu0 %v1657_v3 }
  0x3c   : > { %v608_v36 = vor.u32 %v607_v29, %v603_v26  ;;  %v612_v37 = vrot.slane %v610_v30, 1  ;;  %v699_v45 = vrot.slane %v1869_v38, 1  ;;  %v700_v50 = vrot.slane %v1880_v51, 1  ;;  %1603 = vmatpush3.bf16.msra.mxu1 %v1657_v3  ;;  %1564 = vmatprep.subr.bf16.mxu0 %v1658_v7 }
  0x3d   : > { %642 = vrot.lane.b32.xlu1 %v577_v35, %s1669_s22  ;;  %v505_v35 = vsel %vm397_vm1, %v500_v27, %v504_v28  ;;  %v677_v40 = vsel %vm650_vm0, %v675_v32, %v676_v33  ;;  %v399_v53 = vshrl.u32 %v1893_v59, 16  ;;  %v704_v56 = vsel %vm650_vm0, %v702_v41, %v703_v43  ;;  %1601 = vmatprep.subr.bf16.mxu1 %v1658_v7 }
  0x3e   : > { %626 = vrot.lane.b32.xlu0 %v481_v39, %s1669_s22  ;;  %v401_v39 = vshll.u32 %v1893_v59, 16  ;;  %v701_v46 = vsel %vm650_vm0, %v699_v45, %v700_v50  ;;  %v1017_v14 = vsel %vm1015_vm3, %v1659_v11, 0 }
  0x3f   : > { %1565 = vmatpush3.bf16.msra.mxu0 %v1658_v7 }
  0x40   : > { %v403_v54 = vrot.slane %v401_v39, 1  ;;  %1604 = vmatpush3.bf16.msra.mxu1 %v1658_v7  ;;  %1606 = vmatprep.subr.msk.bf16.mxu0 %vm1015_vm3, %v1659_v11 }
  0x41   : > { %644 = vrot.lane.b32.xlu1 %v589_v52, %s1669_s22  ;;  %v613_v52 = vsel %vm397_vm1, %v608_v36, %v612_v37  ;;  %1607 = vmatprep.subr.msk.bf16.mxu1 %vm1015_vm3, %v1659_v11 }
  0x42   : > { %628 = vrot.lane.b32.xlu0 %v493_v55, %s1669_s22  ;;  %v406_v55 = vshll.u32 %v1656_v5, 16 }
  0x43   : > { %1567 = vmatpush3.bf16.msra.mxu0 %v1017_v14 }
  0x44   : > { %v408_v1 = vrot.slane %v406_v55, 1  ;;  %1605 = vmatpush3.bf16.msra.mxu1 %v1017_v14 }
  0x45   : > { %733 = vrot.lane.b32.xlu1 %v695_v60, %s1668_s21  ;;  %v404_v60 = vor.u32 %v403_v54, %v399_v53 }
  0x46   : > { %717 = vrot.lane.b32.xlu0 %v671_v12, %s1668_s21 }
  0x47   : > { %v409_v51 = vsel %vm397_vm1, %v404_v60, %v408_v1 }
  0x49   : > { %735 = vrot.lane.b32.xlu1 %v698_v21, %s1668_s21 }
  0x4a   : > { %719 = vrot.lane.b32.xlu0 %v674_v22, %s1668_s21 }
  0x4d   : > { %646 = vrot.lane.b32.xlu1 %v601_v34, %s1669_s22 }
  0x4e   : > { %630 = vrot.lane.b32.xlu0 %v505_v35, %s1669_s22 }
  0x51   : > { %721 = vrot.lane.b32.xlu1 %v677_v40, %s1668_s21 }
  0x52   : > { %648 = vrot.lane.b32.xlu0 %v613_v52, %s1669_s22 }
  0x55   : > { %739 = vrot.lane.b32.xlu1 %v704_v56, %s1668_s21 }
  0x56   : > { %737 = vrot.lane.b32.xlu0 %v701_v46, %s1668_s21 }
  0x59   : > { %705 = vrot.lane.b32.xlu1 %v653_v19, %s1668_s21 }
  0x5a   : > { %614 = vrot.lane.b32.xlu0 %v409_v51, %s1669_s22 }
  0x87   : > { %v724_v5 = vpop.permute.xlu1 %723 }
  0x88   : > { %v708_v61 = vpop.permute.xlu0 %707 }
  0x8b   : > { %v726_v9 = vpop.permute.xlu1 %725 }
  0x8c   : > { %v710_v10 = vpop.permute.xlu0 %709 }
  0x8f   : > { %v619_v13 = vpop.permute.xlu1 %618 }
  0x90   : > { %v617_v15 = vpop.permute.xlu0 %616  ;;  %v747_v17 = vsel %vm741_vm2, %v1727_v8, %v619_v13 }
  0x91   : > { %v745_v12 = vsel %vm741_vm2, %v1718_v2, %v617_v15  ;;  %v1963_v2 = vsel %vm778_vm4, %v747_v17, %v710_v10 }
  0x92   : > { %v1951_v16 = vsel %vm778_vm4, %v745_v12, %v708_v61 }
  0x93   : > { %831 = vrot.lane.b32.xlu0 %v1951_v16, %s1670_s29  ;;  %v635_v18 = vpop.permute.xlu1 %634 }
  0x94   : > { %v633_v20 = vpop.permute.xlu0 %632  ;;  %v763_v22 = vsel %vm741_vm2, %v1723_v6, %v635_v18 }
  0x95   : > { %v761_v19 = vsel %vm741_vm2, %v1714_v0, %v633_v20  ;;  %v1972_v24 = vsel %vm778_vm4, %v763_v22, %v726_v9 }
  0x96   : > { %v1960_v21 = vsel %vm778_vm4, %v761_v19, %v724_v5 }
  0x97   : > { %847 = vrot.lane.b32.xlu1 %v1960_v21, %s1670_s29  ;;  %833 = vrot.lane.b32.xlu0 %v1963_v2, %s1670_s29  ;;  %v637_v8 = vpop.permute.xlu1 %636 }
  0x98   : > { %v621_v23 = vpop.permute.xlu0 %620  ;;  %v765_v30 = vsel %vm741_vm2, %v1743_v25, %v637_v8 }
  0x99   : > { %v749_v6 = vsel %vm741_vm2, %v1758_v47, %v621_v23 }
  0x9b   : > { %849 = vrot.lane.b32.xlu1 %v1972_v24, %s1670_s29  ;;  %864 = vrot.lane.b32.xlu0 %v1963_v2, %s1671_s30  ;;  %v728_v0 = vpop.permute.xlu1 %727 }
  0x9c   : > { %v712_v26 = vpop.permute.xlu0 %711  ;;  %v1990_v32 = vsel %vm778_vm4, %v765_v30, %v728_v0 }
  0x9d   : > { %v1981_v27 = vsel %vm778_vm4, %v749_v6, %v712_v26 }
  0x9f   : > { %880 = vrot.lane.b32.xlu1 %v1972_v24, %s1671_s30  ;;  %866 = vrot.lane.b32.xlu0 %v1981_v27, %s1671_s30  ;;  %v639_v28 = vpop.permute.xlu1 %638 }
  0xa0   : > { %v623_v29 = vpop.permute.xlu0 %622  ;;  %v767_v34 = vsel %vm741_vm2, %v1762_v49, %v639_v28 }
  0xa1   : > { %v751_v25 = vsel %vm741_vm2, %v1771_v58, %v623_v29 }
  0xa3   : > { %882 = vrot.lane.b32.xlu1 %v1990_v32, %s1671_s30  ;;  %835 = vrot.lane.b32.xlu0 %v1981_v27, %s1670_s29  ;;  %v641_v47 = vpop.permute.xlu1 %640 }
  0xa4   : > { %v625_v33 = vpop.permute.xlu0 %624  ;;  %v769_v45 = vsel %vm741_vm2, %v1774_v63, %v641_v47 }
  0xa5   : > { %v753_v41 = vsel %vm741_vm2, %v1802_v31, %v625_v33 }
  0xa7   : > { %851 = vrot.lane.b32.xlu1 %v1990_v32, %s1670_s29  ;;  %v730_v35 = vpop.permute.xlu1 %729 }
  0xa8   : > { %v714_v36 = vpop.permute.xlu0 %713  ;;  %v2003_v37 = vsel %vm778_vm4, %v767_v34, %v730_v35 }
  0xa9   : > { %v2006_v39 = vsel %vm778_vm4, %v751_v25, %v714_v36 }
  0xaa   : > { %837 = vrot.lane.b32.xlu0 %v2006_v39, %s1670_s29 }
  0xab   : > { %853 = vrot.lane.b32.xlu1 %v2003_v37, %s1670_s29  ;;  %v732_v49 = vpop.permute.xlu1 %731 }
  0xac   : > { %v716_v40 = vpop.permute.xlu0 %715  ;;  %v2026_v52 = vsel %vm778_vm4, %v769_v45, %v732_v49 }
  0xad   : > { %v2021_v50 = vsel %vm778_vm4, %v753_v41, %v716_v40 }
  0xae   : > { %868 = vrot.lane.b32.xlu0 %v2006_v39, %s1671_s30 }
  0xaf   : > { %884 = vrot.lane.b32.xlu1 %v2003_v37, %s1671_s30  ;;  %v643_v58 = vpop.permute.xlu1 %642 }
  0xb0   : > { %v627_v43 = vpop.permute.xlu0 %626  ;;  %v771_v63 = vsel %vm741_vm2, %v1811_v44, %v643_v58 }
  0xb1   : > { %v755_v55 = vsel %vm741_vm2, %v1818_v48, %v627_v43 }
  0xb2   : > { %870 = vrot.lane.b32.xlu0 %v2021_v50, %s1671_s30 }
  0xb3   : > { %886 = vrot.lane.b32.xlu1 %v2026_v52, %s1671_s30  ;;  %v645_v53 = vpop.permute.xlu1 %644 }
  0xb4   : > { %v629_v54 = vpop.permute.xlu0 %628  ;;  %v773_v5 = vsel %vm741_vm2, %v1833_v62, %v645_v53 }
  0xb5   : > { %v757_v51 = vsel %vm741_vm2, %v1838_v4, %v629_v54 }
  0xb6   : > { %839 = vrot.lane.b32.xlu0 %v2021_v50, %s1670_s29 }
  0xb7   : > { %855 = vrot.lane.b32.xlu1 %v2026_v52, %s1670_s29  ;;  %v734_v31 = vpop.permute.xlu1 %733 }
  0xb8   : > { %v718_v56 = vpop.permute.xlu0 %717  ;;  %v2039_v46 = vsel %vm778_vm4, %v771_v63, %v734_v31 }
  0xb9   : > { %v2042_v60 = vsel %vm778_vm4, %v755_v55, %v718_v56 }
  0xba   : > { %841 = vrot.lane.b32.xlu0 %v2042_v60, %s1670_s29 }
  0xbb   : > { %857 = vrot.lane.b32.xlu1 %v2039_v46, %s1670_s29  ;;  %v736_v44 = vpop.permute.xlu1 %735 }
  0xbc   : > { %v720_v1 = vpop.permute.xlu0 %719  ;;  %v2062_v7 = vsel %vm778_vm4, %v773_v5, %v736_v44 }
  0xbd   : > { %v2057_v61 = vsel %vm778_vm4, %v757_v51, %v720_v1 }
  0xbe   : > { %872 = vrot.lane.b32.xlu0 %v2042_v60, %s1671_s30 }
  0xbf   : > { %888 = vrot.lane.b32.xlu1 %v2039_v46, %s1671_s30  ;;  %v647_v48 = vpop.permute.xlu1 %646 }
  0xc0   : > { %v631_v3 = vpop.permute.xlu0 %630  ;;  %v775_v11 = vsel %vm741_vm2, %v1869_v38, %v647_v48 }
  0xc1   : > { %v759_v13 = vsel %vm741_vm2, %v1873_v42, %v631_v3 }
  0xc2   : > { %874 = vrot.lane.b32.xlu0 %v2057_v61, %s1671_s30 }
  0xc3   : > { %890 = vrot.lane.b32.xlu1 %v2062_v7, %s1671_s30  ;;  %v722_v9 = vpop.permute.xlu1 %721 }
  0xc4   : > { %v649_v10 = vpop.permute.xlu0 %648  ;;  %v796_v12 = vsel %vm778_vm4, %v759_v13, %v722_v9 }
  0xc5   : > { %v777_v62 = vsel %vm741_vm2, %v1890_v57, %v649_v10 }
  0xc6   : > { %843 = vrot.lane.b32.xlu0 %v2057_v61, %s1670_s29 }
  0xc7   : > { %859 = vrot.lane.b32.xlu1 %v2062_v7, %s1670_s29  ;;  %v740_v4 = vpop.permute.xlu1 %739 }
  0xc8   : > { %v738_v14 = vpop.permute.xlu0 %737  ;;  %v814_v15 = vsel %vm778_vm4, %v777_v62, %v740_v4 }
  0xc9   : > { %v812_v17 = vsel %vm778_vm4, %v775_v11, %v738_v14 }
  0xca   : > { %845 = vrot.lane.b32.xlu0 %v796_v12, %s1670_s29 }
  0xcb   : > { %861 = vrot.lane.b32.xlu1 %v812_v17, %s1670_s29  ;;  %v706_v57 = vpop.permute.xlu1 %705 }
  0xcc   : > { %v615_v18 = vpop.permute.xlu0 %614 }
  0xcd   : > { %v743_v20 = vsel %vm741_vm2, %v1893_v59, %v615_v18 }
  0xce   : > { %876 = vrot.lane.b32.xlu0 %v796_v12, %s1671_s30  ;;  %v780_v38 = vsel %vm778_vm4, %v743_v20, %v706_v57 }
  0xcf   : > { %892 = vrot.lane.b32.xlu1 %v812_v17, %s1671_s30 }
  0xd2   : > { %878 = vrot.lane.b32.xlu0 %v1960_v21, %s1671_s30 }
  0xd3   : > { %894 = vrot.lane.b32.xlu1 %v814_v15, %s1671_s30 }
 0x105   : > { %v832_v42 = vpop.permute.xlu0 %831 }
 0x106   : > { %v898_v8 = vsel %vm896_vm5, %v780_v38, %v832_v42 }
 0x109   : > { %v848_v19 = vpop.permute.xlu1 %847  ;;  %v834_v22 = vpop.permute.xlu0 %833 }
 0x10a   : > { %v914_v6 = vsel %vm896_vm5, %v796_v12, %v848_v19  ;;  %v900_v26 = vsel %vm896_vm5, %v1951_v16, %v834_v22  ;;  %v2154_v22 = vld [vmem:[%s2234_s2] ss:$0 sm:$0xff] }
 0x10d   : > { %v850_v59 = vpop.permute.xlu1 %849  ;;  %v865_v23 = vpop.permute.xlu0 %864 }
 0x10e   : > { %v931_v0 = vsel %vm929_vm6, %v898_v8, %v865_v23  ;;  %v916_v33 = vsel %vm896_vm5, %v1960_v21, %v850_v59 }
 0x10f   : > { %1568 = vmatprep.mubr.msk.bf16.mxu0 %vm982_vm7, %v931_v0 }
 0x111   : > { %v881_v28 = vpop.permute.xlu1 %880  ;;  %v867_v29 = vpop.permute.xlu0 %866 }
 0x112   : > { %v933_v30 = vsel %vm929_vm6, %v900_v26, %v867_v29  ;;  %v947_v47 = vsel %vm929_vm6, %v914_v6, %v881_v28 }
 0x113   : > { %1569 = vmatmul.mubr.msk.bf16.vlgmr.msra.gmra.mrb[0].mxu0 %vm982_vm7, %v933_v30  ;;  %1584 = vmatprep.mubr.msk.bf16.mxu1 %vm982_vm7, %v947_v47 }
 0x115   : > { %v883_v34 = vpop.permute.xlu1 %882  ;;  %v836_v25 = vpop.permute.xlu0 %835 }
 0x116   : > { %v949_v35 = vsel %vm929_vm6, %v916_v33, %v883_v34  ;;  %v902_v40 = vsel %vm896_vm5, %v1963_v2, %v836_v25 }
 0x117   : > { %1585 = vmatmul.mubr.msk.bf16.vlgmr.msra.gmra.mrb[0].mxu1 %vm982_vm7, %v949_v35 }
 0x119   : > { %v852_v16 = vpop.permute.xlu1 %851 }
 0x11a   : > { %v918_v41 = vsel %vm896_vm5, %v1972_v24, %v852_v16 }
 0x11c   : > { %v838_v36 = vpop.permute.xlu0 %837 }
 0x11d   : > { %v854_v49 = vpop.permute.xlu1 %853  ;;  %v904_v53 = vsel %vm896_vm5, %v1981_v27, %v838_v36 }
 0x11e   : > { %v920_v2 = vsel %vm896_vm5, %v1990_v32, %v854_v49 }
 0x120   : > { %v869_v58 = vpop.permute.xlu0 %868 }
 0x121   : > { %v935_v43 = vsel %vm929_vm6, %v902_v40, %v869_v58  ;;  %v885_v45 = vpop.permute.xlu1 %884 }
 0x122   : > { %v951_v21 = vsel %vm929_vm6, %v918_v41, %v885_v45  ;;  %1572 = vmatprep.mubr.msk.bf16.mxu0 %vm982_vm7, %v935_v43 }
 0x123   : > { %1588 = vmatprep.mubr.msk.bf16.mxu1 %vm982_vm7, %v951_v21 }
 0x124   : > { %v871_v54 = vpop.permute.xlu0 %870 }
 0x125   : > { %v937_v63 = vsel %vm929_vm6, %v904_v53, %v871_v54  ;;  %v887_v31 = vpop.permute.xlu1 %886 }
 0x126   : > { %v953_v24 = vsel %vm929_vm6, %v920_v2, %v887_v31  ;;  %1573 = vmatmul.mubr.msk.bf16.gmra.mrb[4].mxu0 %vm982_vm7, %v937_v63 }
 0x127   : > { %1589 = vmatmul.mubr.msk.bf16.gmra.mrb[4].mxu1 %vm982_vm7, %v953_v24 }
 0x128   : > { %v840_v55 = vpop.permute.xlu0 %839 }
 0x129   : > { %v856_v56 = vpop.permute.xlu1 %855  ;;  %v906_v27 = vsel %vm896_vm5, %v2006_v39, %v840_v55 }
 0x12a   : > { %v922_v32 = vsel %vm896_vm5, %v2003_v37, %v856_v56 }
 0x12c   : > { %v842_v44 = vpop.permute.xlu0 %841 }
 0x12d   : > { %v858_v1 = vpop.permute.xlu1 %857  ;;  %v908_v9 = vsel %vm896_vm5, %v2021_v50, %v842_v44 }
 0x12e   : > { %v924_v39 = vsel %vm896_vm5, %v2026_v52, %v858_v1 }
 0x130   : > { %v873_v48 = vpop.permute.xlu0 %872 }
 0x131   : > { %v939_v51 = vsel %vm929_vm6, %v906_v27, %v873_v48  ;;  %v889_v3 = vpop.permute.xlu1 %888 }
 0x132   : > { %v955_v5 = vsel %vm929_vm6, %v922_v32, %v889_v3  ;;  %1576 = vmatprep.mubr.msk.bf16.mxu0 %vm982_vm7, %v939_v51 }
 0x133   : > { %1592 = vmatprep.mubr.msk.bf16.mxu1 %vm982_vm7, %v955_v5 }
 0x134   : > { %v875_v10 = vpop.permute.xlu0 %874 }
 0x135   : > { %v941_v62 = vsel %vm929_vm6, %v908_v9, %v875_v10  ;;  %v891_v4 = vpop.permute.xlu1 %890 }
 0x136   : > { %v957_v37 = vsel %vm929_vm6, %v924_v39, %v891_v4  ;;  %1577 = vmatmul.mubr.msk.bf16.gmra.mrb[8].mxu0 %vm982_vm7, %v941_v62 }
 0x137   : > { %1593 = vmatmul.mubr.msk.bf16.gmra.mrb[8].mxu1 %vm982_vm7, %v957_v37 }
 0x138   : > { %v844_v11 = vpop.permute.xlu0 %843 }
 0x139   : > { %v860_v13 = vpop.permute.xlu1 %859  ;;  %v910_v50 = vsel %vm896_vm5, %v2042_v60, %v844_v11 }
 0x13a   : > { %v926_v52 = vsel %vm896_vm5, %v2039_v46, %v860_v13 }
 0x13c   : > { %v846_v14 = vpop.permute.xlu0 %845 }
 0x13d   : > { %v862_v15 = vpop.permute.xlu1 %861  ;;  %v912_v20 = vsel %vm896_vm5, %v2057_v61, %v846_v14  ;;  %v2159_v61 = vld [vmem:[%s2235_s3] ss:$0 sm:$0xff] }
 0x13e   : > { %v928_v60 = vsel %vm896_vm5, %v2062_v7, %v862_v15 }
 0x140   : > { %v877_v12 = vpop.permute.xlu0 %876 }
 0x141   : > { %v943_v17 = vsel %vm929_vm6, %v910_v50, %v877_v12  ;;  %v893_v57 = vpop.permute.xlu1 %892 }
 0x142   : > { %v959_v18 = vsel %vm929_vm6, %v926_v52, %v893_v57  ;;  %1580 = vmatprep.mubr.msk.bf16.mxu0 %vm982_vm7, %v943_v17 }
 0x143   : > { %1596 = vmatprep.mubr.msk.bf16.mxu1 %vm982_vm7, %v959_v18 }
 0x144   : > { %v879_v38 = vpop.permute.xlu0 %878 }
 0x145   : > { %v945_v42 = vsel %vm929_vm6, %v912_v20, %v879_v38  ;;  %v895_v19 = vpop.permute.xlu1 %894 }
 0x146   : > { %v961_v46 = vsel %vm929_vm6, %v928_v60, %v895_v19  ;;  %1581 = vmatmul.mubr.msk.bf16.gmra.mrb[12].mxu0 %vm982_vm7, %v945_v42 }
 0x147   : > { %1597 = vmatmul.mubr.msk.bf16.gmra.mrb[12].mxu1 %vm982_vm7, %v961_v46 }
 0x1e6   : > { %v1570_v8 = vpop.f32.mrb[0].mxu0 }
 0x1e7   : > { %v1053_v7 = vpop.f32.mrb[1].mxu0  ;;  %v1189_v0 = vmul.f32 %v1570_v8, %v2154_v22 }
 0x1e8   : > { %v1187_v59 = vmul.f32 %v2154_v22, %v1053_v7  ;;  %v1571_v23 = vpop.f32.mrb[2].mxu0 }
 0x1e9   : > { %v1056_v6 = vpop.f32.mrb[3].mxu0  ;;  %v1228_v25 = vadd.f32 %v2159_v61, %v1189_v0  ;;  %v1190_v16 = vmul.f32 %v1571_v23, %v2154_v22 }
 0x1ea   : > { %v1226_v26 = vadd.f32 %v2159_v61, %v1187_v59  ;;  %v1188_v28 = vmul.f32 %v2154_v22, %v1056_v6  ;;  %v1586_v29 = vpop.f32.mrb[0].mxu1 }
 0x1eb   : > { %v1117_v30 = vpop.f32.mrb[1].mxu1  ;;  %v1205_v36 = vmul.f32 %v1586_v29, %v2154_v22  ;;  %v1229_v53 = vadd.f32 %v2159_v61, %v1190_v16  ;;  %vm1260_vm11 = vcmp.ge.f32.partialorder %v1228_v25, 0.0  ;;  %v1292_v2 = vmul.f32 0.01, %v1228_v25 }
 0x1ec   : > { %v1227_v47 = vadd.f32 %v2159_v61, %v1188_v28  ;;  %v1203_v33 = vmul.f32 %v2154_v22, %v1117_v30  ;;  %v1587_v34 = vpop.f32.mrb[2].mxu1  ;;  %vm1258_vm8 = vcmp.ge.f32.partialorder %v1226_v26, 0.0  ;;  %v1290_v35 = vmul.f32 0.01, %v1226_v26 }
 0x1ed   : > { %v1120_v49 = vpop.f32.mrb[3].mxu1  ;;  %v1244_v54 = vadd.f32 %v2159_v61, %v1205_v36  ;;  %v1206_v63 = vmul.f32 %v1587_v34, %v2154_v22  ;;  %v1324_v56 = vsel %vm1260_vm11, %v1228_v25, %v1292_v2  ;;  %v1293_v48 = vmul.f32 0.01, %v1229_v53 }
 0x1ee   : > { %v1242_v40 = vadd.f32 %v2159_v61, %v1203_v33  ;;  %v1204_v58 = vmul.f32 %v2154_v22, %v1120_v49  ;;  %v1322_v41 = vsel %vm1258_vm8, %v1226_v26, %v1290_v35  ;;  %vm1259_vm9 = vcmp.ge.f32.partialorder %v1227_v47, 0.0 }
 0x1ef   : > { %1354 = vxpose.xlu0.b32.start [1/16] (narrow) %v1322_v41, 8  ;;  %v1291_v43 = vmul.f32 0.01, %v1227_v47  ;;  %v1245_v44 = vadd.f32 %v2159_v61, %v1206_v63  ;;  %v1308_v27 = vmul.f32 0.01, %v1244_v54  ;;  %vm1276_vm13 = vcmp.ge.f32.partialorder %v1244_v54, 0.0 }
 0x1f0   : > { %v1243_v45 = vadd.f32 %v2159_v61, %v1204_v58  ;;  %vm1274_vm10 = vcmp.ge.f32.partialorder %v1242_v40, 0.0  ;;  %v1306_v21 = vmul.f32 0.01, %v1242_v40  ;;  %vm1261_vm14 = vcmp.ge.f32.partialorder %v1229_v53, 0.0 }
 0x1f1   : > { %v1323_v24 = vsel %vm1259_vm9, %v1227_v47, %v1291_v43  ;;  %v1340_v5 = vsel %vm1276_vm13, %v1244_v54, %v1308_v27  ;;  %v1325_v9 = vsel %vm1261_vm14, %v1229_v53, %v1293_v48  ;;  %v1309_v10 = vmul.f32 0.01, %v1245_v44 }
 0x1f2   : > { %v1338_v31 = vsel %vm1274_vm10, %v1242_v40, %v1306_v21  ;;  %v1307_v55 = vmul.f32 0.01, %v1243_v45  ;;  %vm1275_vm12 = vcmp.ge.f32.partialorder %v1243_v45, 0.0  ;;  %vm1277_vm15 = vcmp.ge.f32.partialorder %v1245_v44, 0.0 }
 0x1f3   : > { %1386 = vxpose.xlu1.b32.start [1/16] (narrow) %v1338_v31, 8  ;;  %1355 = vxpose.xlu0.b32.cont [2/16] (narrow) %v1323_v24, 8  ;;  %v1341_v18 = vsel %vm1277_vm15, %v1245_v44, %v1309_v10 }
 0x1f4   : > { %v1339_v1 = vsel %vm1275_vm12, %v1243_v45, %v1307_v55 }
 0x1f7   : > { %1387 = vxpose.xlu1.b32.cont [2/16] (narrow) %v1339_v1, 8  ;;  %1356 = vxpose.xlu0.b32.cont [3/16] (narrow) %v1324_v56, 8 }
 0x1f9   : > { %v1574_v32 = vpop.f32.mrb[4].mxu0 }
 0x1fa   : > { %v1069_v51 = vpop.f32.mrb[5].mxu0  ;;  %v1590_v3 = vpop.f32.mrb[4].mxu1  ;;  %v1193_v14 = vmul.f32 %v1574_v32, %v2154_v22 }
 0x1fb   : > { %v1191_v39 = vmul.f32 %v2154_v22, %v1069_v51  ;;  %1388 = vxpose.xlu1.b32.cont [3/16] (narrow) %v1340_v5, 8  ;;  %v1133_v62 = vpop.f32.mrb[5].mxu1  ;;  %1357 = vxpose.xlu0.b32.cont [4/16] (narrow) %v1325_v9, 8  ;;  %v1575_v4 = vpop.f32.mrb[6].mxu0  ;;  %v1209_v50 = vmul.f32 %v1590_v3, %v2154_v22 }
 0x1fc   : > { %v1207_v37 = vmul.f32 %v2154_v22, %v1133_v62  ;;  %v1072_v11 = vpop.f32.mrb[7].mxu0  ;;  %v1591_v13 = vpop.f32.mrb[6].mxu1  ;;  %v1194_v60 = vmul.f32 %v1575_v4, %v2154_v22  ;;  %v1232_v46 = vadd.f32 %v2159_v61, %v1193_v14 }
 0x1fd   : > { %v1230_v15 = vadd.f32 %v2159_v61, %v1191_v39  ;;  %v1192_v12 = vmul.f32 %v2154_v22, %v1072_v11  ;;  %v1136_v52 = vpop.f32.mrb[7].mxu1  ;;  %v1248_v8 = vadd.f32 %v2159_v61, %v1209_v50  ;;  %v1210_v23 = vmul.f32 %v1591_v13, %v2154_v22 }
 0x1fe   : > { %v1246_v17 = vadd.f32 %v2159_v61, %v1207_v37  ;;  %v1208_v57 = vmul.f32 %v2154_v22, %v1136_v52  ;;  %v1233_v26 = vadd.f32 %v2159_v61, %v1194_v60  ;;  %v1296_v29 = vmul.f32 0.01, %v1232_v46 }
 0x1ff   : > { %v1231_v20 = vadd.f32 %v2159_v61, %v1192_v12  ;;  %1389 = vxpose.xlu1.b32.cont [4/16] (narrow) %v1341_v18, 8  ;;  %vm1262_vm0 = vcmp.ge.f32.partialorder %v1230_v15, 0.0  ;;  %v1294_v38 = vmul.f32 0.01, %v1230_v15  ;;  %v1249_v30 = vadd.f32 %v2159_v61, %v1210_v23 }
 0x200   : > { %v1247_v42 = vadd.f32 %v2159_v61, %v1208_v57  ;;  %vm1278_vm1 = vcmp.ge.f32.partialorder %v1246_v17, 0.0  ;;  %v1310_v19 = vmul.f32 0.01, %v1246_v17  ;;  %vm1264_vm4 = vcmp.ge.f32.partialorder %v1232_v46, 0.0 }
 0x201   : > { %v1326_v7 = vsel %vm1262_vm0, %v1230_v15, %v1294_v38  ;;  %v1295_v59 = vmul.f32 0.01, %v1231_v20  ;;  %vm1263_vm2 = vcmp.ge.f32.partialorder %v1231_v20, 0.0  ;;  %v1312_v33 = vmul.f32 0.01, %v1248_v8 }
 0x202   : > { %1358 = vxpose.xlu0.b32.cont [5/16] (narrow) %v1326_v7, 8  ;;  %v1342_v0 = vsel %vm1278_vm1, %v1246_v17, %v1310_v19  ;;  %v1311_v6 = vmul.f32 0.01, %v1247_v42  ;;  %vm1279_vm3 = vcmp.ge.f32.partialorder %v1247_v42, 0.0  ;;  %vm1280_vm5 = vcmp.ge.f32.partialorder %v1248_v8, 0.0 }
 0x203   : > { %1390 = vxpose.xlu1.b32.cont [5/16] (narrow) %v1342_v0, 8  ;;  %v1327_v28 = vsel %vm1263_vm2, %v1231_v20, %v1295_v59  ;;  %v1297_v34 = vmul.f32 0.01, %v1233_v26  ;;  %v1328_v25 = vsel %vm1264_vm4, %v1232_v46, %v1296_v29  ;;  %vm1265_vm6 = vcmp.ge.f32.partialorder %v1233_v26, 0.0 }
 0x204   : > { %v1343_v47 = vsel %vm1279_vm3, %v1247_v42, %v1311_v6  ;;  %v1344_v49 = vsel %vm1280_vm5, %v1248_v8, %v1312_v33  ;;  %v1313_v40 = vmul.f32 0.01, %v1249_v30  ;;  %vm1281_vm7 = vcmp.ge.f32.partialorder %v1249_v30, 0.0 }
 0x205   : > { %v1329_v54 = vsel %vm1265_vm6, %v1233_v26, %v1297_v34 }
 0x206   : > { %1359 = vxpose.xlu0.b32.cont [6/16] (narrow) %v1327_v28, 8  ;;  %v1345_v1 = vsel %vm1281_vm7, %v1249_v30, %v1313_v40 }
 0x207   : > { %1391 = vxpose.xlu1.b32.cont [6/16] (narrow) %v1343_v47, 8 }
 0x209   : > { %v1578_v35 = vpop.f32.mrb[8].mxu0 }
 0x20a   : > { %v1594_v16 = vpop.f32.mrb[8].mxu1  ;;  %1360 = vxpose.xlu0.b32.cont [7/16] (narrow) %v1328_v25, 8  ;;  %v1085_v36 = vpop.f32.mrb[9].mxu0  ;;  %v1197_v2 = vmul.f32 %v1578_v35, %v2154_v22 }
 0x20b   : > { %v1195_v58 = vmul.f32 %v2154_v22, %v1085_v36  ;;  %1392 = vxpose.xlu1.b32.cont [7/16] (narrow) %v1344_v49, 8  ;;  %v1579_v41 = vpop.f32.mrb[10].mxu0  ;;  %v1149_v43 = vpop.f32.mrb[9].mxu1  ;;  %v1213_v63 = vmul.f32 %v1594_v16, %v2154_v22 }
 0x20c   : > { %v1211_v45 = vmul.f32 %v2154_v22, %v1149_v43  ;;  %v1088_v21 = vpop.f32.mrb[11].mxu0  ;;  %v1595_v53 = vpop.f32.mrb[10].mxu1  ;;  %v1198_v32 = vmul.f32 %v1579_v41, %v2154_v22  ;;  %v1236_v5 = vadd.f32 %v2159_v61, %v1197_v2 }
 0x20d   : > { %v1234_v31 = vadd.f32 %v2159_v61, %v1195_v58  ;;  %v1196_v24 = vmul.f32 %v2154_v22, %v1088_v21  ;;  %v1152_v55 = vpop.f32.mrb[11].mxu1  ;;  %v1252_v9 = vadd.f32 %v2159_v61, %v1213_v63  ;;  %v1214_v62 = vmul.f32 %v1595_v53, %v2154_v22 }
 0x20e   : > { %v1250_v56 = vadd.f32 %v2159_v61, %v1211_v45  ;;  %v1212_v44 = vmul.f32 %v2154_v22, %v1152_v55  ;;  %1361 = vxpose.xlu0.b32.cont [8/16] (narrow) %v1329_v54, 8  ;;  %v1237_v11 = vadd.f32 %v2159_v61, %v1198_v32  ;;  %v1300_v14 = vmul.f32 0.01, %v1236_v5 }
 0x20f   : > { %v1235_v27 = vadd.f32 %v2159_v61, %v1196_v24  ;;  %1393 = vxpose.xlu1.b32.cont [8/16] (narrow) %v1345_v1, 8  ;;  %vm1266_vm8 = vcmp.ge.f32.partialorder %v1234_v31, 0.0  ;;  %v1298_v48 = vmul.f32 0.01, %v1234_v31  ;;  %v1253_v15 = vadd.f32 %v2159_v61, %v1214_v62 }
 0x210   : > { %v1251_v51 = vadd.f32 %v2159_v61, %v1212_v44  ;;  %vm1282_vm9 = vcmp.ge.f32.partialorder %v1250_v56, 0.0  ;;  %v1314_v3 = vmul.f32 0.01, %v1250_v56  ;;  %vm1268_vm12 = vcmp.ge.f32.partialorder %v1236_v5, 0.0 }
 0x211   : > { %v1330_v10 = vsel %vm1266_vm8, %v1234_v31, %v1298_v48  ;;  %v1299_v39 = vmul.f32 0.01, %v1235_v27  ;;  %vm1267_vm10 = vcmp.ge.f32.partialorder %v1235_v27, 0.0  ;;  %v1316_v12 = vmul.f32 0.01, %v1252_v9 }
 0x212   : > { %1362 = vxpose.xlu0.b32.cont [9/16] (narrow) %v1330_v10, 8  ;;  %v1346_v4 = vsel %vm1282_vm9, %v1250_v56, %v1314_v3  ;;  %v1315_v37 = vmul.f32 0.01, %v1251_v51  ;;  %vm1283_vm11 = vcmp.ge.f32.partialorder %v1251_v51, 0.0  ;;  %vm1284_vm13 = vcmp.ge.f32.partialorder %v1252_v9, 0.0 }
 0x213   : > { %1394 = vxpose.xlu1.b32.cont [9/16] (narrow) %v1346_v4, 8  ;;  %v1331_v13 = vsel %vm1267_vm10, %v1235_v27, %v1299_v39  ;;  %v1301_v52 = vmul.f32 0.01, %v1237_v11  ;;  %v1332_v57 = vsel %vm1268_vm12, %v1236_v5, %v1300_v14  ;;  %vm1269_vm14 = vcmp.ge.f32.partialorder %v1237_v11, 0.0 }
 0x214   : > { %v1347_v50 = vsel %vm1283_vm11, %v1251_v51, %v1315_v37  ;;  %v1348_v38 = vsel %vm1284_vm13, %v1252_v9, %v1316_v12  ;;  %v1317_v60 = vmul.f32 0.01, %v1253_v15  ;;  %vm1285_vm15 = vcmp.ge.f32.partialorder %v1253_v15, 0.0 }
 0x215   : > { %v1333_v23 = vsel %vm1269_vm14, %v1237_v11, %v1301_v52 }
 0x216   : > { %1363 = vxpose.xlu0.b32.cont [10/16] (narrow) %v1331_v13, 8  ;;  %v1349_v34 = vsel %vm1285_vm15, %v1253_v15, %v1317_v60 }
 0x217   : > { %1395 = vxpose.xlu1.b32.cont [10/16] (narrow) %v1347_v50, 8 }
 0x219   : > { %v1582_v17 = vpop.f32.mrb[12].mxu0 }
 0x21a   : > { %v1598_v18 = vpop.f32.mrb[12].mxu1  ;;  %1364 = vxpose.xlu0.b32.cont [11/16] (narrow) %v1332_v57, 8  ;;  %v1101_v20 = vpop.f32.mrb[13].mxu0  ;;  %v1201_v0 = vmul.f32 %v1582_v17, %v2154_v22 }
 0x21b   : > { %v1199_v42 = vmul.f32 %v2154_v22, %v1101_v20  ;;  %1396 = vxpose.xlu1.b32.cont [11/16] (narrow) %v1348_v38, 8  ;;  %v1583_v19 = vpop.f32.mrb[14].mxu0  ;;  %v1165_v46 = vpop.f32.mrb[13].mxu1  ;;  %v1217_v30 = vmul.f32 %v1598_v18, %v2154_v22 }
 0x21c   : > { %v1215_v8 = vmul.f32 %v2154_v22, %v1165_v46  ;;  %v1104_v7 = vpop.f32.mrb[15].mxu0  ;;  %v1599_v59 = vpop.f32.mrb[14].mxu1  ;;  %v1240_v40 = vadd.f32 %v2159_v61, %v1201_v0  ;;  %v1202_v58 = vmul.f32 %v1583_v19, %v2154_v22 }
 0x21d   : > { %v1238_v6 = vadd.f32 %v2159_v61, %v1199_v42  ;;  %v1200_v26 = vmul.f32 %v2154_v22, %v1104_v7  ;;  %v1218_v28 = vmul.f32 %v1599_v59, %v2154_v22  ;;  %v1168_v29 = vpop.f32.mrb[15].mxu1  ;;  %v1256_v45 = vadd.f32 %v2159_v61, %v1217_v30 }
 0x21e   : > { %v1254_v47 = vadd.f32 %v2159_v61, %v1215_v8  ;;  %v1216_v33 = vmul.f32 %v2154_v22, %v1168_v29  ;;  %1365 = vxpose.xlu0.b32.cont [12/16] (narrow) %v1333_v23, 8  ;;  %v1241_v54 = vadd.f32 %v2159_v61, %v1202_v58  ;;  %v1304_v63 = vmul.f32 0.01, %v1240_v40 }
 0x21f   : > { %v1239_v35 = vadd.f32 %v2159_v61, %v1200_v26  ;;  %v1257_v25 = vadd.f32 %v2159_v61, %v1218_v28  ;;  %1397 = vxpose.xlu1.b32.cont [12/16] (narrow) %v1349_v34, 8  ;;  %vm1270_vm0 = vcmp.ge.f32.partialorder %v1238_v6, 0.0  ;;  %v1302_v16 = vmul.f32 0.01, %v1238_v6 }
 0x220   : > { %v1255_v36 = vadd.f32 %v2159_v61, %v1216_v33  ;;  %vm1286_vm1 = vcmp.ge.f32.partialorder %v1254_v47, 0.0  ;;  %v1318_v49 = vmul.f32 0.01, %v1254_v47  ;;  %vm1272_vm4 = vcmp.ge.f32.partialorder %v1240_v40, 0.0 }
 0x221   : > { %v1334_v41 = vsel %vm1270_vm0, %v1238_v6, %v1302_v16  ;;  %v1303_v43 = vmul.f32 0.01, %v1239_v35  ;;  %vm1271_vm2 = vcmp.ge.f32.partialorder %v1239_v35, 0.0  ;;  %v1320_v24 = vmul.f32 0.01, %v1256_v45 }
 0x222   : > { %1366 = vxpose.xlu0.b32.cont [13/16] (narrow) %v1334_v41, 8  ;;  %v1350_v21 = vsel %vm1286_vm1, %v1254_v47, %v1318_v49  ;;  %v1319_v53 = vmul.f32 0.01, %v1255_v36  ;;  %vm1287_vm3 = vcmp.ge.f32.partialorder %v1255_v36, 0.0  ;;  %vm1288_vm5 = vcmp.ge.f32.partialorder %v1256_v45, 0.0 }
 0x223   : > { %1398 = vxpose.xlu1.b32.cont [13/16] (narrow) %v1350_v21, 8  ;;  %v1335_v2 = vsel %vm1271_vm2, %v1239_v35, %v1303_v43  ;;  %v1336_v22 = vsel %vm1272_vm4, %v1240_v40, %v1304_v63  ;;  %v1305_v55 = vmul.f32 0.01, %v1241_v54  ;;  %v1352_v56 = vsel %vm1288_vm5, %v1256_v45, %v1320_v24 }
 0x224   : > { %v1351_v31 = vsel %vm1287_vm3, %v1255_v36, %v1319_v53  ;;  %vm1273_vm6 = vcmp.ge.f32.partialorder %v1241_v54, 0.0  ;;  %v1321_v44 = vmul.f32 0.01, %v1257_v25  ;;  %vm1289_vm7 = vcmp.ge.f32.partialorder %v1257_v25, 0.0 }
 0x225   : > { %v1337_v1 = vsel %vm1273_vm6, %v1241_v54, %v1305_v55 }
 0x226   : > { %1367 = vxpose.xlu0.b32.cont [14/16] (narrow) %v1335_v2, 8  ;;  %v1353_v61 = vsel %vm1289_vm7, %v1257_v25, %v1321_v44 }
 0x227   : > { %1399 = vxpose.xlu1.b32.cont [14/16] (narrow) %v1351_v31, 8 }
 0x22a   : > { %1368 = vxpose.xlu0.b32.cont [15/16] (narrow) %v1336_v22, 8 }
 0x22b   : > { %1400 = vxpose.xlu1.b32.cont [15/16] (narrow) %v1352_v56, 8 }
 0x22e   : > { %1369 = vxpose.xlu0.b32.end [16/16] (narrow) %v1337_v1, 8 }
 0x22f   : > { %1401 = vxpose.xlu1.b32.end [16/16] (narrow) %v1353_v61, 8 }
 0x272   : > { %v1370_v27 = vpop.trf.xlu0 }
 0x273   : > { %v1402_v48 = vpop.trf.xlu1  ;;  %1418 = vst [vmem:[%s197_s12] sm:$0xff] %v1370_v27 }
 0x274   : > { %1419 = vst [vmem:[%s197_s12 + $0x8] sm:$0xff] %v1402_v48 }
 0x275 PF: > { %s14_s15 = sadd.s32 1, %s1666_s15  }
 0x276   : > { %p11_p4 = scmp.ge.s32.totalorder %s14_s15, 4  }
 0x278   :  { %13 = sbr.rel (!%p11_p4) target bundleno = 1 (0x1), region = 66 }

</bundles_post_ra>
